<compile_context>
chip_gen: v5e
topology: v5e:2x2
jax: 0.10.0
libtpu: 0.0.40
codegen_flags: <defaults>
</compile_context>

<pallas_src>
import functools

import jax
import jax.numpy as jnp
from jax.experimental import pallas as pl
from jax.experimental.pallas import tpu as pltpu


def _pair(v):
    if isinstance(v, (tuple, list)):
        return (int(v[0]), int(v[1]))
    return (int(v), int(v))


def _round_up(x, m):
    return ((x + m - 1) // m) * m


def _pick_toh(OH, OW, sublane, target=256, cap=2048):
    """Output-row tile: M = toh*OW ~= `target`, preferably a sublane multiple."""
    toh = max(1, min(OH, -(-target // OW)))
    for extra in range(sublane):
        t = toh + extra
        if (t * OW) % sublane == 0 and t * OW <= max(cap, toh * OW):
            return t
    return toh  # non-multiple M is still correct (just sublane-padded)


# ---------------------------------------------------------------------------
# Kernel: for one (image n, tile of toh output rows, tile of TOC out channels)
#   1) (only on the first oc step) build the im2col slab in VMEM scratch from the
#      phase-decomposed, VMEM-resident padded image (all tap offsets static), then
#   2) ONE MXU matmul  (toh*OW, KH*KW*Cg) @ (KH*KW*Cg, TOC)  in f32, + bias, store.
# There is no accumulator live across a tap loop: the slab writes carry no f32
# state and the single matmul result streams to the output block.
# ---------------------------------------------------------------------------
def _conv_body(x_ref, w_ref, b_ref, o_ref, slab_ref, *, KH, KW, sh, sw, dh, dw,
               toh, OW, Cg, noc):
    # x_ref:    (P, Ph, Pw, Cg)     phase-decomposed padded image (resident per n)
    # w_ref:    (KH*KW*Cg, TOC)     tap-major weight slice for this oc tile
    # b_ref:    (1, TOC) f32        or None
    # o_ref:    (toh, OW, TOC)
    # slab_ref: (toh*OW, KH*KW*Cg)  compute-dtype scratch (persists across steps)
    M = toh * OW
    oh0 = pl.program_id(1) * toh

    def build_slab():
        for i in range(KH):
            for j in range(KW):
                t = i * KW + j
                # Static tap offsets: phase index + row/col offsets inside the phase.
                p = ((i * dh) % sh) * sw + ((j * dw) % sw)
                ro = (i * dh) // sh
                co = (j * dw) // sw
                xs = x_ref[p, pl.ds(oh0 + ro, toh), pl.ds(co, OW), :]  # (toh,OW,Cg)
                slab_ref[:, t * Cg:(t + 1) * Cg] = xs.reshape(M, Cg)

    if noc == 1:
        build_slab()
    else:
        # oc is the innermost, sequential ("arbitrary") grid axis: build the slab
        # once per (n, row-tile) and reuse it for the remaining oc tiles.
        pl.when(pl.program_id(2) == 0)(build_slab)

    # Single MXU matmul with K = KH*KW*Cg instead of KH*KW under-filled K=Cg ones.
    acc = jnp.dot(slab_ref[...], w_ref[...], preferred_element_type=jnp.float32)
    if b_ref is not None:
        acc = acc + b_ref[...]
    o_ref[...] = acc.reshape(toh, OW, o_ref.shape[-1]).astype(o_ref.dtype)


def _conv_kernel_bias(x_ref, w_ref, b_ref, o_ref, slab_ref, **meta):
    _conv_body(x_ref, w_ref, b_ref, o_ref, slab_ref, **meta)


def _conv_kernel_nobias(x_ref, w_ref, o_ref, slab_ref, **meta):
    _conv_body(x_ref, w_ref, None, o_ref, slab_ref, **meta)


def _conv2d_group(x_ph, w_mat, b_mat, *, N, OHp, OW, TOC, noc, toh, KH, KW,
                  sh, sw, dh, dw, Cg, out_dtype, cdt, vmem_limit):
    P = sh * sw
    _, _, Ph, Pw, _ = x_ph.shape
    Kdim = KH * KW * Cg
    On = noc * TOC
    meta = dict(KH=KH, KW=KW, sh=sh, sw=sw, dh=dh, dw=dw, toh=toh, OW=OW,
                Cg=Cg, noc=noc)

    in_specs = [
        # Whole phase-decomposed image for batch n.  N-outermost layout -> one
        # contiguous DMA per image; the index is constant across (row-tile, oc)
        # grid steps so the block stays VMEM-resident.
        pl.BlockSpec((None, P, Ph, Pw, Cg), lambda n, m, c: (n, 0, 0, 0, 0)),
        # Tap-major weight matrix; one lane-dense TOC slice per oc grid step.
        # TODO(synk): single-buffer (pipeline_mode=pl.Buffered(1)) the weight/bias
        # specs when noc == 1 to reclaim the second pipeline buffer's VMEM.
        pl.BlockSpec((Kdim, TOC), lambda n, m, c: (0, c)),
    ]
    if b_mat is not None:
        in_specs.append(pl.BlockSpec((1, TOC), lambda n, m, c: (0, c)))
        kernel = functools.partial(_conv_kernel_bias, **meta)
        args = (x_ph, w_mat, b_mat)
    else:
        kernel = functools.partial(_conv_kernel_nobias, **meta)
        args = (x_ph, w_mat)

    # Prefer sharding the batch axis across TensorCores (v7x megacore): if the
    # row-tile axis were core-split, both cores would DMA the same resident image.
    dims = (("parallel", "arbitrary", "arbitrary") if N > 1
            else ("parallel", "parallel", "arbitrary"))

    return pl.pallas_call(
        kernel,
        out_shape=jax.ShapeDtypeStruct((N, OHp, OW, On), out_dtype),
        grid_spec=pltpu.PrefetchScalarGridSpec(
            num_scalar_prefetch=0,
            grid=(N, OHp // toh, noc),
            in_specs=in_specs,
            # Lane-dense output block: last dim TOC is a multiple of 128.
            out_specs=pl.BlockSpec((None, toh, OW, TOC),
                                   lambda n, m, c: (n, m, 0, c)),
            scratch_shapes=[pltpu.VMEM((toh * OW, Kdim), cdt)],
        ),
        compiler_params=pltpu.CompilerParams(
            dimension_semantics=dims,
            vmem_limit_bytes=vmem_limit),
    )(*args)


def meta_conv2d(x, weight, bias=None, stride=(1, 1), padding=(0, 0),
                dilation=(1, 1), groups=1, compute_dtype=None):
    """F.conv2d forward. x: (N, Cin, H, W); weight: (O, Cin/groups, KH, KW).

    compute_dtype=None defaults to bf16 compute (f32 accumulation, f32/x-dtype
    output) when x is f32; pass jnp.float32 for full-precision compute.
    """
    sh, sw = _pair(stride)
    ph, pw = _pair(padding)
    dh, dw = _pair(dilation)
    N, Cin, H, W = map(int, x.shape)
    O, Cg, KH, KW = map(int, weight.shape)
    assert Cin == Cg * groups and O % groups == 0
    Og = O // groups

    OH = (H + 2 * ph - dh * (KH - 1) - 1) // sh + 1
    OW = (W + 2 * pw - dw * (KW - 1) - 1) // sw + 1
    assert OH > 0 and OW > 0

    out_dtype = x.dtype
    if compute_dtype is None:
        cdt = jnp.bfloat16 if x.dtype == jnp.float32 else x.dtype
    else:
        cdt = jnp.dtype(compute_dtype)

    # ---- M tile (output rows per grid step) and padded output height ----------
    sub = 16 if jnp.dtype(cdt).itemsize == 2 else 8
    toh = _pick_toh(OH, OW, sub)
    OHp = _round_up(OH, toh)

    # ---- one-time layout glue: single pass over the input, no KH*KW blow-up ----
    # Zero-pad (conv padding + stride alignment + the extra rows the OHp tiles
    # read), then phase/space-to-batch decompose so that for any stride/dilation
    # every tap is a contiguous (toh, OW) window inside the kernel.
    Hp2 = _round_up(H + 2 * ph, sh) + (OHp - OH) * sh
    Wp2 = _round_up(W + 2 * pw, sw)
    x_nhwc = jnp.transpose(x, (0, 2, 3, 1)).astype(cdt)            # (N, H, W, Cin)
    xp = jnp.pad(x_nhwc, ((0, 0), (ph, Hp2 - H - ph), (pw, Wp2 - W - pw), (0, 0)))
    Ph, Pw = Hp2 // sh, Wp2 // sw
    P = sh * sw
    x_ph = xp.reshape(N, Ph, sh, Pw, sw, Cin)
    x_ph = x_ph.transpose(0, 2, 4, 1, 3, 5).reshape(N, P, Ph, Pw, Cin)

    # ---- output-channel tiling: 256-wide MXU N-tiles for wide layers -----------
    TOC = 256 if Og > 128 else 128
    On = _round_up(Og, TOC)
    noc = On // TOC
    Kdim = KH * KW * Cg
    M = toh * OW

    # ---- generation-aware VMEM budget (double-buffered blocks + scratch) -------
    isz = jnp.dtype(cdt).itemsize
    osz = jnp.dtype(out_dtype).itemsize
    est = (2 * P * Ph * Pw * Cg * isz        # resident image block (x2 buffers)
           + 2 * Kdim * TOC * isz            # weight tile
           + 2 * TOC * 4                     # bias tile
           + 2 * M * TOC * osz               # output block
           + M * Kdim * isz                  # im2col slab scratch
           + M * TOC * 4)                    # f32 matmul result
    try:
        vmem_cap = int(pltpu.get_tpu_info().vmem_capacity_bytes)
    except Exception:
        vmem_cap = 64 * 1024 * 1024          # conservative (v7x per-core) fallback
    vmem_limit = int(min(max(2 * est, 32 * 1024 * 1024), int(0.85 * vmem_cap)))
    # TODO(synk): for feature maps too large for whole-image VMEM residency even
    # at 0.85*capacity, additionally tile the resident image along H.

    # TODO(synk): fold `groups` into the pallas grid (and special-case depthwise
    # onto a VPU multiply-add kernel) instead of one pallas_call per group.
    outs = []
    for g in range(groups):
        xg = x_ph if groups == 1 else x_ph[..., g * Cg:(g + 1) * Cg]
        wg = weight[g * Og:(g + 1) * Og]                       # (Og, Cg, KH, KW)
        # Tap-major, channel-minor K layout (matches the slab columns).
        w_mat = jnp.transpose(wg, (2, 3, 1, 0)).reshape(Kdim, Og).astype(cdt)
        if On != Og:
            w_mat = jnp.pad(w_mat, ((0, 0), (0, On - Og)))
        if bias is not None:
            bg = bias[g * Og:(g + 1) * Og].astype(jnp.float32)
            if On != Og:
                bg = jnp.pad(bg, (0, On - Og))
            b_mat = bg.reshape(1, On)
        else:
            b_mat = None

        o = _conv2d_group(xg, w_mat, b_mat, N=N, OHp=OHp, OW=OW, TOC=TOC,
                          noc=noc, toh=toh, KH=KH, KW=KW, sh=sh, sw=sw,
                          dh=dh, dw=dw, Cg=Cg, out_dtype=out_dtype, cdt=cdt,
                          vmem_limit=vmem_limit)
        outs.append(o[:, :OH, :, :Og])

    out_nhwc = outs[0] if groups == 1 else jnp.concatenate(outs, axis=-1)
    # Single boundary transpose back to PyTorch's NCHW output layout.
    return jnp.transpose(out_nhwc, (0, 3, 1, 2))


# ---------------------------------------------------------------------------
# Demo / self-check
# ---------------------------------------------------------------------------
if __name__ == "__main__":
    key = jax.random.PRNGKey(0)
    kx, kw1, kw2, kb = jax.random.split(key, 4)

    # Typical wideresnet conv config at small shapes: 3x3, stride 1, pad 1, bias.
    N, Cin, H, W = 2, 4, 16, 16
    Cout, KH, KW = 8, 3, 3

    x = jax.random.normal(kx, (N, Cin, H, W), dtype=jnp.float32)
    fan_in = Cin * KH * KW
    bound = 1.0 / (fan_in ** 0.5)
    weight = jax.random.uniform(kw1, (Cout, Cin, KH, KW),
                                minval=-bound, maxval=bound, dtype=jnp.float32)
    bias = jax.random.uniform(kb, (Cout,), minval=-bound, maxval=bound,
                              dtype=jnp.float32)

    def ref_conv(xx, ww, bb, st, pd, dl, gr):
        r = jax.lax.conv_general_dilated(
            xx, ww, window_strides=st, padding=[(pd[0], pd[0]), (pd[1], pd[1])],
            rhs_dilation=dl, dimension_numbers=("NCHW", "OIHW", "NCHW"),
            feature_group_count=gr, precision=jax.lax.Precision.HIGHEST)
        if bb is not None:
            r = r + bb.reshape(1, -1, 1, 1)
        return r

    # 1) f32 compute, stride 1, padding 1, bias.
    fwd = jax.jit(functools.partial(meta_conv2d, stride=(1, 1), padding=(1, 1),
                                    dilation=(1, 1), groups=1,
                                    compute_dtype=jnp.float32))
    out = jax.block_until_ready(fwd(x, weight, bias))
    ref = ref_conv(x, weight, bias, (1, 1), (1, 1), (1, 1), 1)
    assert out.shape == (N, Cout, H, W)
    assert jnp.allclose(out, ref, atol=3e-2, rtol=3e-2)

    # 2) strided, no-bias (exercises phase decomposition + bias-less kernel).
    fwd2 = jax.jit(functools.partial(meta_conv2d, stride=(2, 2), padding=(1, 1),
                                     compute_dtype=jnp.float32))
    out2 = jax.block_until_ready(fwd2(x, weight, None))
    ref2 = ref_conv(x, weight, None, (2, 2), (1, 1), (1, 1), 1)
    assert out2.shape == ref2.shape
    assert jnp.allclose(out2, ref2, atol=3e-2, rtol=3e-2)

    # 3) dilated conv (exercises tap offsets with dilation).
    fwd3 = jax.jit(functools.partial(meta_conv2d, stride=(1, 1), padding=(2, 2),
                                     dilation=(2, 2), compute_dtype=jnp.float32))
    out3 = jax.block_until_ready(fwd3(x, weight, bias))
    ref3 = ref_conv(x, weight, bias, (1, 1), (2, 2), (2, 2), 1)
    assert out3.shape == ref3.shape
    assert jnp.allclose(out3, ref3, atol=3e-2, rtol=3e-2)

    # 4) grouped conv (groups=2).
    wg = jax.random.uniform(kw2, (Cout, Cin // 2, KH, KW),
                            minval=-bound, maxval=bound, dtype=jnp.float32)
    fwd4 = jax.jit(functools.partial(meta_conv2d, stride=(1, 1), padding=(1, 1),
                                     groups=2, compute_dtype=jnp.float32))
    out4 = jax.block_until_ready(fwd4(x, wg, bias))
    ref4 = ref_conv(x, wg, bias, (1, 1), (1, 1), (1, 1), 2)
    assert out4.shape == ref4.shape
    assert jnp.allclose(out4, ref4, atol=3e-2, rtol=3e-2)

    # 5) default path: bf16 compute (f32 accumulation), loose tolerance.
    fwd5 = jax.jit(functools.partial(meta_conv2d, stride=(1, 1), padding=(1, 1)))
    out5 = jax.block_until_ready(fwd5(x, weight, bias))
    assert out5.shape == (N, Cout, H, W)
    assert jnp.allclose(out5, ref, atol=1e-1, rtol=1e-1)

    print("KERNEL_OK")
</pallas_src>

<mosaic_0001>
module attributes {stable_mosaic.version = 11 : i64} {
  func.func @_conv_kernel_bias(%arg0: i32, %arg1: i32, %arg2: i32, %arg3: memref<1x1x18x18x4xf32, #tpu.memory_space<vmem>>, %arg4: memref<36x128xf32, #tpu.memory_space<vmem>>, %arg5: memref<1x128xf32, #tpu.memory_space<vmem>>, %arg6: memref<1x16x16x128xf32, #tpu.memory_space<vmem>>, %arg7: memref<256x36xf32, #tpu.memory_space<vmem>>) attributes {dimension_semantics = [#tpu.dimension_semantics<parallel>, #tpu.dimension_semantics<arbitrary>, #tpu.dimension_semantics<arbitrary>], iteration_bounds = array<i64: 2, 1, 1>, scalar_prefetch = 0 : i64, scratch_operands = 1 : i64, tpu.core_type = #tpu.core_type<tc>, window_params = [{transform_indices = @transform_0, window_bounds = array<i64: 1, 1, 18, 18, 4>}, {transform_indices = @transform_1, window_bounds = array<i64: 36, 128>}, {transform_indices = @transform_2, window_bounds = array<i64: 1, 128>}, {transform_indices = @transform_3, window_bounds = array<i64: 1, 16, 16, 128>}]} {
    %c16_i32 = arith.constant 16 : i32
    %0 = arith.muli %arg1, %c16_i32 : i32
    %c0_i32 = arith.constant 0 : i32
    %1 = arith.addi %0, %c0_i32 : i32
    %c0 = arith.constant 0 : index
    %c0_0 = arith.constant 0 : index
    %2 = arith.index_cast %1 : i32 to index
    %c0_1 = arith.constant 0 : index
    %c0_2 = arith.constant 0 : index
    %3 = vector.load %arg3[%c0, %c0_0, %2, %c0_1, %c0_2] : memref<1x1x18x18x4xf32, #tpu.memory_space<vmem>>, vector<1x1x16x16x4xf32>
    %4 = vector.shape_cast %3 : vector<1x1x16x16x4xf32> to vector<16x16x4xf32>
    %5 = vector.shape_cast %4 : vector<16x16x4xf32> to vector<256x4xf32>
    %c0_3 = arith.constant 0 : index
    %c0_4 = arith.constant 0 : index
    %6 = vector.load %arg7[%c0_3, %c0_4] : memref<256x36xf32, #tpu.memory_space<vmem>>, vector<256x4xf32>
    tpu.vector_store %arg7[%c0_3, %c0_4], %5 {strides = array<i32>} : memref<256x36xf32, #tpu.memory_space<vmem>>, vector<256x4xf32>,
    %c0_i32_5 = arith.constant 0 : i32
    %7 = arith.addi %0, %c0_i32_5 : i32
    %c0_6 = arith.constant 0 : index
    %c0_7 = arith.constant 0 : index
    %8 = arith.index_cast %7 : i32 to index
    %c1 = arith.constant 1 : index
    %c0_8 = arith.constant 0 : index
    %9 = vector.load %arg3[%c0_6, %c0_7, %8, %c1, %c0_8] : memref<1x1x18x18x4xf32, #tpu.memory_space<vmem>>, vector<1x1x16x16x4xf32>
    %10 = vector.shape_cast %9 : vector<1x1x16x16x4xf32> to vector<16x16x4xf32>
    %11 = vector.shape_cast %10 : vector<16x16x4xf32> to vector<256x4xf32>
    %c0_9 = arith.constant 0 : index
    %c4 = arith.constant 4 : index
    %12 = vector.load %arg7[%c0_9, %c4] : memref<256x36xf32, #tpu.memory_space<vmem>>, vector<256x4xf32>
    tpu.vector_store %arg7[%c0_9, %c4], %11 {strides = array<i32>} : memref<256x36xf32, #tpu.memory_space<vmem>>, vector<256x4xf32>,
    %c0_i32_10 = arith.constant 0 : i32
    %13 = arith.addi %0, %c0_i32_10 : i32
    %c0_11 = arith.constant 0 : index
    %c0_12 = arith.constant 0 : index
    %14 = arith.index_cast %13 : i32 to index
    %c2 = arith.constant 2 : index
    %c0_13 = arith.constant 0 : index
    %15 = vector.load %arg3[%c0_11, %c0_12, %14, %c2, %c0_13] : memref<1x1x18x18x4xf32, #tpu.memory_space<vmem>>, vector<1x1x16x16x4xf32>
    %16 = vector.shape_cast %15 : vector<1x1x16x16x4xf32> to vector<16x16x4xf32>
    %17 = vector.shape_cast %16 : vector<16x16x4xf32> to vector<256x4xf32>
    %c0_14 = arith.constant 0 : index
    %c8 = arith.constant 8 : index
    %18 = vector.load %arg7[%c0_14, %c8] : memref<256x36xf32, #tpu.memory_space<vmem>>, vector<256x4xf32>
    tpu.vector_store %arg7[%c0_14, %c8], %17 {strides = array<i32>} : memref<256x36xf32, #tpu.memory_space<vmem>>, vector<256x4xf32>,
    %c1_i32 = arith.constant 1 : i32
    %19 = arith.addi %0, %c1_i32 : i32
    %c0_15 = arith.constant 0 : index
    %c0_16 = arith.constant 0 : index
    %20 = arith.index_cast %19 : i32 to index
    %c0_17 = arith.constant 0 : index
    %c0_18 = arith.constant 0 : index
    %21 = vector.load %arg3[%c0_15, %c0_16, %20, %c0_17, %c0_18] : memref<1x1x18x18x4xf32, #tpu.memory_space<vmem>>, vector<1x1x16x16x4xf32>
    %22 = vector.shape_cast %21 : vector<1x1x16x16x4xf32> to vector<16x16x4xf32>
    %23 = vector.shape_cast %22 : vector<16x16x4xf32> to vector<256x4xf32>
    %c0_19 = arith.constant 0 : index
    %c12 = arith.constant 12 : index
    %24 = vector.load %arg7[%c0_19, %c12] : memref<256x36xf32, #tpu.memory_space<vmem>>, vector<256x4xf32>
    tpu.vector_store %arg7[%c0_19, %c12], %23 {strides = array<i32>} : memref<256x36xf32, #tpu.memory_space<vmem>>, vector<256x4xf32>,
    %c1_i32_20 = arith.constant 1 : i32
    %25 = arith.addi %0, %c1_i32_20 : i32
    %c0_21 = arith.constant 0 : index
    %c0_22 = arith.constant 0 : index
    %26 = arith.index_cast %25 : i32 to index
    %c1_23 = arith.constant 1 : index
    %c0_24 = arith.constant 0 : index
    %27 = vector.load %arg3[%c0_21, %c0_22, %26, %c1_23, %c0_24] : memref<1x1x18x18x4xf32, #tpu.memory_space<vmem>>, vector<1x1x16x16x4xf32>
    %28 = vector.shape_cast %27 : vector<1x1x16x16x4xf32> to vector<16x16x4xf32>
    %29 = vector.shape_cast %28 : vector<16x16x4xf32> to vector<256x4xf32>
    %c0_25 = arith.constant 0 : index
    %c16 = arith.constant 16 : index
    %30 = vector.load %arg7[%c0_25, %c16] : memref<256x36xf32, #tpu.memory_space<vmem>>, vector<256x4xf32>
    tpu.vector_store %arg7[%c0_25, %c16], %29 {strides = array<i32>} : memref<256x36xf32, #tpu.memory_space<vmem>>, vector<256x4xf32>,
    %c1_i32_26 = arith.constant 1 : i32
    %31 = arith.addi %0, %c1_i32_26 : i32
    %c0_27 = arith.constant 0 : index
    %c0_28 = arith.constant 0 : index
    %32 = arith.index_cast %31 : i32 to index
    %c2_29 = arith.constant 2 : index
    %c0_30 = arith.constant 0 : index
    %33 = vector.load %arg3[%c0_27, %c0_28, %32, %c2_29, %c0_30] : memref<1x1x18x18x4xf32, #tpu.memory_space<vmem>>, vector<1x1x16x16x4xf32>
    %34 = vector.shape_cast %33 : vector<1x1x16x16x4xf32> to vector<16x16x4xf32>
    %35 = vector.shape_cast %34 : vector<16x16x4xf32> to vector<256x4xf32>
    %c0_31 = arith.constant 0 : index
    %c20 = arith.constant 20 : index
    %36 = vector.load %arg7[%c0_31, %c20] : memref<256x36xf32, #tpu.memory_space<vmem>>, vector<256x4xf32>
    tpu.vector_store %arg7[%c0_31, %c20], %35 {strides = array<i32>} : memref<256x36xf32, #tpu.memory_space<vmem>>, vector<256x4xf32>,
    %c2_i32 = arith.constant 2 : i32
    %37 = arith.addi %0, %c2_i32 : i32
    %c0_32 = arith.constant 0 : index
    %c0_33 = arith.constant 0 : index
    %38 = arith.index_cast %37 : i32 to index
    %c0_34 = arith.constant 0 : index
    %c0_35 = arith.constant 0 : index
    %39 = vector.load %arg3[%c0_32, %c0_33, %38, %c0_34, %c0_35] : memref<1x1x18x18x4xf32, #tpu.memory_space<vmem>>, vector<1x1x16x16x4xf32>
    %40 = vector.shape_cast %39 : vector<1x1x16x16x4xf32> to vector<16x16x4xf32>
    %41 = vector.shape_cast %40 : vector<16x16x4xf32> to vector<256x4xf32>
    %c0_36 = arith.constant 0 : index
    %c24 = arith.constant 24 : index
    %42 = vector.load %arg7[%c0_36, %c24] : memref<256x36xf32, #tpu.memory_space<vmem>>, vector<256x4xf32>
    tpu.vector_store %arg7[%c0_36, %c24], %41 {strides = array<i32>} : memref<256x36xf32, #tpu.memory_space<vmem>>, vector<256x4xf32>,
    %c2_i32_37 = arith.constant 2 : i32
    %43 = arith.addi %0, %c2_i32_37 : i32
    %c0_38 = arith.constant 0 : index
    %c0_39 = arith.constant 0 : index
    %44 = arith.index_cast %43 : i32 to index
    %c1_40 = arith.constant 1 : index
    %c0_41 = arith.constant 0 : index
    %45 = vector.load %arg3[%c0_38, %c0_39, %44, %c1_40, %c0_41] : memref<1x1x18x18x4xf32, #tpu.memory_space<vmem>>, vector<1x1x16x16x4xf32>
    %46 = vector.shape_cast %45 : vector<1x1x16x16x4xf32> to vector<16x16x4xf32>
    %47 = vector.shape_cast %46 : vector<16x16x4xf32> to vector<256x4xf32>
    %c0_42 = arith.constant 0 : index
    %c28 = arith.constant 28 : index
    %48 = vector.load %arg7[%c0_42, %c28] : memref<256x36xf32, #tpu.memory_space<vmem>>, vector<256x4xf32>
    tpu.vector_store %arg7[%c0_42, %c28], %47 {strides = array<i32>} : memref<256x36xf32, #tpu.memory_space<vmem>>, vector<256x4xf32>,
    %c2_i32_43 = arith.constant 2 : i32
    %49 = arith.addi %0, %c2_i32_43 : i32
    %c0_44 = arith.constant 0 : index
    %c0_45 = arith.constant 0 : index
    %50 = arith.index_cast %49 : i32 to index
    %c2_46 = arith.constant 2 : index
    %c0_47 = arith.constant 0 : index
    %51 = vector.load %arg3[%c0_44, %c0_45, %50, %c2_46, %c0_47] : memref<1x1x18x18x4xf32, #tpu.memory_space<vmem>>, vector<1x1x16x16x4xf32>
    %52 = vector.shape_cast %51 : vector<1x1x16x16x4xf32> to vector<16x16x4xf32>
    %53 = vector.shape_cast %52 : vector<16x16x4xf32> to vector<256x4xf32>
    %c0_48 = arith.constant 0 : index
    %c32 = arith.constant 32 : index
    %54 = vector.load %arg7[%c0_48, %c32] : memref<256x36xf32, #tpu.memory_space<vmem>>, vector<256x4xf32>
    tpu.vector_store %arg7[%c0_48, %c32], %53 {strides = array<i32>} : memref<256x36xf32, #tpu.memory_space<vmem>>, vector<256x4xf32>,
    %c0_49 = arith.constant 0 : index
    %c0_50 = arith.constant 0 : index
    %55 = vector.load %arg7[%c0_49, %c0_50] : memref<256x36xf32, #tpu.memory_space<vmem>>, vector<256x36xf32>
    %c0_51 = arith.constant 0 : index
    %c0_52 = arith.constant 0 : index
    %56 = vector.load %arg4[%c0_51, %c0_52] : memref<36x128xf32, #tpu.memory_space<vmem>>, vector<36x128xf32>
    %cst = arith.constant dense<0.000000e+00> : vector<256x128xf32>
    %57 = tpu.matmul %55, %56, %cst {dimension_numbers = #tpu.dot_dimension_numbers<[1], [0], [0], [1], [0, 0, 1, 1], [], []>} : vector<256x36xf32>, vector<36x128xf32>, vector<256x128xf32> -> vector<256x128xf32>
    %c0_53 = arith.constant 0 : index
    %c0_54 = arith.constant 0 : index
    %58 = vector.load %arg5[%c0_53, %c0_54] : memref<1x128xf32, #tpu.memory_space<vmem>>, vector<1x128xf32>
    %59 = vector.broadcast %58 : vector<1x128xf32> to vector<256x128xf32>
    %60 = arith.addf %57, %59 : vector<256x128xf32>
    %61 = vector.shape_cast %60 : vector<256x128xf32> to vector<16x16x128xf32>
    %c0_55 = arith.constant 0 : index
    %c0_56 = arith.constant 0 : index
    %c0_57 = arith.constant 0 : index
    %c0_58 = arith.constant 0 : index
    %62 = vector.load %arg6[%c0_55, %c0_56, %c0_57, %c0_58] : memref<1x16x16x128xf32, #tpu.memory_space<vmem>>, vector<1x16x16x128xf32>
    %63 = vector.shape_cast %62 : vector<1x16x16x128xf32> to vector<16x16x128xf32>
    %64 = vector.shape_cast %61 : vector<16x16x128xf32> to vector<1x16x16x128xf32>
    tpu.vector_store %arg6[%c0_55, %c0_56, %c0_57, %c0_58], %64 {strides = array<i32>} : memref<1x16x16x128xf32, #tpu.memory_space<vmem>>, vector<1x16x16x128xf32>,
    return
  }
  func.func @transform_0(%arg0: i32, %arg1: i32, %arg2: i32) -> (i32, i32, i32, i32, i32) {
    %c0_i32 = arith.constant 0 : i32
    %c0_i32_0 = arith.constant 0 : i32
    %c0_i32_1 = arith.constant 0 : i32
    %c0_i32_2 = arith.constant 0 : i32
    %c0_i32_3 = arith.constant 0 : i32
    return %arg0, %c0_i32, %c0_i32_0, %c0_i32_1, %c0_i32_2 : i32, i32, i32, i32, i32
  }
  func.func @transform_1(%arg0: i32, %arg1: i32, %arg2: i32) -> (i32, i32) {
    %c0_i32 = arith.constant 0 : i32
    %c0_i32_0 = arith.constant 0 : i32
    return %c0_i32, %arg2 : i32, i32
  }
  func.func @transform_2(%arg0: i32, %arg1: i32, %arg2: i32) -> (i32, i32) {
    %c0_i32 = arith.constant 0 : i32
    %c0_i32_0 = arith.constant 0 : i32
    return %c0_i32, %arg2 : i32, i32
  }
  func.func @transform_3(%arg0: i32, %arg1: i32, %arg2: i32) -> (i32, i32, i32, i32) {
    %c0_i32 = arith.constant 0 : i32
    %c0_i32_0 = arith.constant 0 : i32
    return %arg0, %arg1, %c0_i32, %arg2 : i32, i32, i32, i32
  }
}

</mosaic_0001>

<bundles_post_ra>
// kernel: meta_conv2d.1
= control target key start
LH: loop header
LB: loop body
LE: loop exit
PB: predicated region body
PF: predicated region fallthrough
CT: control target
= control target key end

     0   :  { %s2623_s12 = smov 0   ;;  %s2625_s13 = smov 0   ;;  %s3897_s0 = inlined_call_operand.vmem [shape: f32[2,1,18,18,4], index: 0, kind: input, shape index: {}]   ;;  %s3898_s1 = inlined_call_operand.vmem [shape: f32[36,128], index: 1, kind: input, shape index: {}]   ;;  %s3899_s2 = inlined_call_operand.vmem [shape: f32[1,128], index: 2, kind: input, shape index: {}]   ;;  %s3900_s3 = inlined_call_operand.vmem [shape: f32[2,16,16,128], index: 3, kind: output, shape index: {}]  }
   0x1   :  { %s2627_s14 = smov 0  }
   0x2 LB: > { %s32_s15 = sadd.s32 1, %s2589_s13  ;;  %p2290_p0 = scmp.ge.s32.totalorder %s2593_s14, 1  ;;  %s2593_s14 = sphi %s2627_s14, %s13_s14   ;;  %s2589_s13 = sphi %s2625_s13, %s3992_s13   ;;  %s2585_s12 = sphi %s2623_s12, %s3991_s12  }
   0x3   : > { %p34_p1 = scmp.ge.s32.totalorder %s32_s15, 2  ;;  %p177_p2 = scmp.lt.s32.totalorder %s2593_s14, 3 }
   0x5   : > { %s3994_s15 = smov (%p34_p1, %s32_s15), 0  ;;  %p178_p3 = pnand %p2290_p0, %p177_p2 }
   0x7   : > { %181 = sbr.rel (%p178_p3) target bundleno = 951 (0x3b7), region = 32 }
   0xc   : > { %p216_p4 = scmp.lt.s32.totalorder %s2585_s12, 1  ;;  %s2595_s20 = smov 4   ;;  %vm277_vm0 = vcmask 31744   ;;  %vm470_vm1 = vcmask 64544   ;;  %vm663_vm2 = vcmask 97344   ;;  %vm859_vm3 = vcmask 130144  }
   0xd   : > { %s2596_s21 = smov 8   ;;  %s2597_s22 = smov 12   ;;  %vm1052_vm4 = vcmask 162944   ;;  %vm1245_vm5 = vcmask 195744   ;;  %vm1441_vm6 = vcmask 228544   ;;  %vm1998_vm7 = vcmask 1043456  }
   0xe   : > { %s3996_s12 = smov (!%p216_p4, %s2585_s12), 1  ;;  %s2598_s23 = smov 16   ;;  %vm1634_vm8 = vcmask 261344   ;;  %vm1827_vm9 = vcmask 294144   ;;  %vm1901_vm10 = vcmask 293888  }
   0xf   : > { %s2537_s16 = smul.u32 432, %s3996_s12  ;;  %s2599_s24 = smov 20  }
  0x10   : > { %s2600_s25 = smov 24   ;;  %s2601_s26 = smov 28  }
  0x11   : > { %s2647_s19 = scalar_lea.vmem %s3897_s0, %s2537_s16  ;;  %s2602_s27 = smov 32  }
  0x12   : > { %v310_v0 = vld [vmem:[%s2647_s19 + $0x1] sm:$0xff]  ;;  %v2651_v1 = vld [vmem:[%s2647_s19 + $0x19] sm:$0xff]  ;;  %v2657_v2 = vld [vmem:[%s2647_s19 + $0x31] sm:$0xff]  ;;  %s2521_s11 = sshll.u32 %s3996_s12, 8 }
  0x13   : > { %374 = vrot.lane.b32.xlu0 %v310_v0, %s2595_s20  ;;  %378 = vrot.lane.b32.xlu1 %v2651_v1, %s2595_s20  ;;  %v311_v3 = vld [vmem:[%s2647_s19 + $0x9] sm:$0xff]  ;;  %v2663_v4 = vld [vmem:[%s2647_s19 + $0x21] sm:$0xff] }
  0x14   : > { %382 = vrot.lane.b32.xlu2 %v2657_v2, %s2595_s20  ;;  %v2669_v5 = vld [vmem:[%s2647_s19 + $0x39] sm:$0xff]  ;;  %v2674_v6 = vld [vmem:[%s2647_s19 + $0x49] sm:$0xff]  ;;  %v2677_v7 = vld [vmem:[%s2647_s19 + $0x51] sm:$0xff] }
  0x15   : > { %v2684_v8 = vld [vmem:[%s2647_s19 + $0x61] sm:$0xff]  ;;  %v2689_v9 = vld [vmem:[%s2647_s19 + $0x69] sm:$0xff]  ;;  %v2692_v10 = vld [vmem:[%s2647_s19 + $0x79] sm:$0xff] }
  0x16   : > { %v2699_v11 = vld [vmem:[%s2647_s19 + $0x81] sm:$0xff]  ;;  %v2704_v12 = vld [vmem:[%s2647_s19 + $0x91] sm:$0xff]  ;;  %v2707_v13 = vld [vmem:[%s2647_s19 + $0x99] sm:$0xff] }
  0x17   : > { %v2714_v14 = vld [vmem:[%s2647_s19 + $0xa9] sm:$0xff]  ;;  %v2719_v15 = vld [vmem:[%s2647_s19 + $0xb1] sm:$0xff]  ;;  %v2722_v16 = vld [vmem:[%s2647_s19 + $0xc1] sm:$0xff] }
  0x18   : > { %v2729_v17 = vld [vmem:[%s2647_s19 + $0xc9] sm:$0xff]  ;;  %v2734_v18 = vld [vmem:[%s2647_s19 + $0xd9] sm:$0xff]  ;;  %v2737_v19 = vld [vmem:[%s2647_s19 + $0xe1] sm:$0xff] }
  0x19   : > { %v2744_v20 = vld [vmem:[%s2647_s19 + $0xf1] sm:$0xff]  ;;  %v2749_v21 = vld [vmem:[%s2647_s19 + $0xf9] sm:$0xff]  ;;  %v2752_v22 = vld [vmem:[%s2647_s19 + $0x109] sm:$0xff] }
  0x1a   : > { %v2759_v23 = vld [vmem:[%s2647_s19 + $0x111] sm:$0xff]  ;;  %v2764_v24 = vld [vmem:[%s2647_s19 + $0x121] sm:$0xff]  ;;  %v2767_v25 = vld [vmem:[%s2647_s19 + $0x129] sm:$0xff] }
  0x1b   : > { %376 = vrot.lane.b32.xlu0 %v311_v3, %s2595_s20  ;;  %380 = vrot.lane.b32.xlu1 %v2663_v4, %s2595_s20  ;;  %v2774_v26 = vld [vmem:[%s2647_s19 + $0x139] sm:$0xff]  ;;  %v2779_v27 = vld [vmem:[%s2647_s19 + $0x141] sm:$0xff] }
  0x1c   : > { %384 = vrot.lane.b32.xlu2 %v2669_v5, %s2595_s20  ;;  %v2782_v28 = vld [vmem:[%s2647_s19 + $0x151] sm:$0xff]  ;;  %v2789_v29 = vld [vmem:[%s2647_s19 + $0x159] sm:$0xff]  ;;  %v2794_v30 = vld [vmem:[%s2647_s19 + $0x169] sm:$0xff] }
  0x1d   : > { %v2797_v31 = vld [vmem:[%s2647_s19 + $0x171] sm:$0xff]  ;;  %v503_v32 = vld [vmem:[%s2647_s19 + $0x2] sm:$0xff]  ;;  %v2809_v35 = vld [vmem:[%s2647_s19 + $0x1a] sm:$0xff] }
  0x1e   : > { %v245_v33 = vld [vmem:[%s2647_s19] sm:$0xff]  ;;  %v504_v34 = vld [vmem:[%s2647_s19 + $0xa] sm:$0xff]  ;;  %3931 = vst [vmem:[#allocation3_spill] sm:$0xff] %v2809_v35  ;;  %v2818_v37 = vld [vmem:[%s2647_s19 + $0x18] sm:$0xff] }
  0x1f   : > { %278 = vst.msk [vmem:[#allocation2] sm:$0xff] %vm277_vm0, %v245_v33  ;;  %v2812_v36 = vld [vmem:[%s2647_s19 + $0x22] sm:$0xff]  ;;  %v2821_v38 = vld [vmem:[%s2647_s19 + $0x30] sm:$0xff]  ;;  %v2835_v41 = vld [vmem:[%s2647_s19 + $0x3a] sm:$0xff] }
  0x20   : > { %3932 = vst [vmem:[#allocation4_spill] sm:$0xff] %v2812_v36  ;;  %v246_v39 = vld [vmem:[%s2647_s19 + $0x8] sm:$0xff]  ;;  %v2832_v40 = vld [vmem:[%s2647_s19 + $0x32] sm:$0xff]  ;;  %v2846_v44 = vld [vmem:[%s2647_s19 + $0x20] sm:$0xff] }
  0x21   : > { %280 = vst.msk [vmem:[#allocation2 + $0x10] sm:$0xff] %vm277_vm0, %v2818_v37  ;;  %v2839_v43 = vld [vmem:[%s2647_s19 + $0x4a] sm:$0xff]  ;;  %v2849_v45 = vld [vmem:[%s2647_s19 + $0x38] sm:$0xff]  ;;  %v2866_v48 = vld [vmem:[%s2647_s19 + $0x62] sm:$0xff] }
  0x22   : > { %282 = vst.msk [vmem:[#allocation2 + $0x20] sm:$0xff] %vm277_vm0, %v2821_v38  ;;  %v2854_v46 = vld [vmem:[%s2647_s19 + $0x48] sm:$0xff]  ;;  %v2863_v47 = vld [vmem:[%s2647_s19 + $0x52] sm:$0xff]  ;;  %v2880_v52 = vld [vmem:[%s2647_s19 + $0x60] sm:$0xff] }
  0x23   : > { %386 = vrot.lane.b32.xlu0 %v2674_v6, %s2595_s20  ;;  %388 = vrot.lane.b32.xlu1 %v2677_v7, %s2595_s20  ;;  %279 = vst.msk [vmem:[#allocation2 + $0x8] sm:$0xff] %vm277_vm0, %v246_v39  ;;  %v2870_v50 = vld [vmem:[%s2647_s19 + $0x6a] sm:$0xff]  ;;  %v2894_v54 = vld [vmem:[%s2647_s19 + $0x7a] sm:$0xff] }
  0x24   : > { %390 = vrot.lane.b32.xlu2 %v2684_v8, %s2595_s20  ;;  %3933 = vst [vmem:[#allocation5_spill] sm:$0xff] %v2832_v40  ;;  %v2877_v51 = vld [vmem:[%s2647_s19 + $0x50] sm:$0xff]  ;;  %v2885_v53 = vld [vmem:[%s2647_s19 + $0x68] sm:$0xff]  ;;  %v2908_v58 = vld [vmem:[%s2647_s19 + $0x78] sm:$0xff] }
  0x25   : > { %3934 = vst [vmem:[#allocation6_spill] sm:$0xff] %v2835_v41  ;;  %v2897_v55 = vld [vmem:[%s2647_s19 + $0x82] sm:$0xff]  ;;  %v2901_v57 = vld [vmem:[%s2647_s19 + $0x92] sm:$0xff]  ;;  %v2925_v63 = vld [vmem:[%s2647_s19 + $0x9a] sm:$0xff] }
  0x26   : > { %3935 = vst [vmem:[#allocation7_spill] sm:$0xff] %v2839_v43  ;;  %v2911_v59 = vld [vmem:[%s2647_s19 + $0x80] sm:$0xff]  ;;  %v2918_v62 = vld [vmem:[%s2647_s19 + $0x90] sm:$0xff]  ;;  %v2941_v33 = vld [vmem:[%s2647_s19 + $0x98] sm:$0xff] }
  0x27   : > { %281 = vst.msk [vmem:[#allocation2 + $0x18] sm:$0xff] %vm277_vm0, %v2846_v44  ;;  %v2928_v0 = vld [vmem:[%s2647_s19 + $0xaa] sm:$0xff] }
  0x28   : > { %283 = vst.msk [vmem:[#allocation2 + $0x28] sm:$0xff] %vm277_vm0, %v2849_v45 }
  0x29   : > { %284 = vst.msk [vmem:[#allocation2 + $0x30] sm:$0xff] %vm277_vm0, %v2854_v46 }
  0x2a   : > { %3936 = vst [vmem:[#allocation8_spill] sm:$0xff] %v2863_v47 }
  0x2b   : > { %392 = vrot.lane.b32.xlu0 %v2689_v9, %s2595_s20  ;;  %394 = vrot.lane.b32.xlu1 %v2692_v10, %s2595_s20  ;;  %3937 = vst [vmem:[#allocation9_spill] sm:$0xff] %v2866_v48 }
  0x2c   : > { %396 = vrot.lane.b32.xlu2 %v2699_v11, %s2595_s20  ;;  %3938 = vst [vmem:[#allocation10_spill] sm:$0xff] %v2870_v50 }
  0x2d   : > { %285 = vst.msk [vmem:[#allocation2 + $0x38] sm:$0xff] %vm277_vm0, %v2877_v51 }
  0x2e   : > { %286 = vst.msk [vmem:[#allocation2 + $0x40] sm:$0xff] %vm277_vm0, %v2880_v52 }
  0x2f   : > { %287 = vst.msk [vmem:[#allocation2 + $0x48] sm:$0xff] %vm277_vm0, %v2885_v53 }
  0x30   : > { %3939 = vst [vmem:[#allocation11_spill] sm:$0xff] %v2894_v54 }
  0x31   : > { %3940 = vst [vmem:[#allocation12_spill] sm:$0xff] %v2897_v55 }
  0x32   : > { %3941 = vst [vmem:[#allocation13_spill] sm:$0xff] %v2901_v57 }
  0x33   : > { %398 = vrot.lane.b32.xlu0 %v2704_v12, %s2595_s20  ;;  %400 = vrot.lane.b32.xlu1 %v2707_v13, %s2595_s20  ;;  %288 = vst.msk [vmem:[#allocation2 + $0x50] sm:$0xff] %vm277_vm0, %v2908_v58 }
  0x34   : > { %402 = vrot.lane.b32.xlu2 %v2714_v14, %s2595_s20  ;;  %289 = vst.msk [vmem:[#allocation2 + $0x58] sm:$0xff] %vm277_vm0, %v2911_v59 }
  0x35   : > { %3942 = vst [vmem:[#allocation14_spill] sm:$0xff] %v2925_v63 }
  0x36   : > { %3943 = vst [vmem:[#allocation15_spill] sm:$0xff] %v2928_v0 }
  0x37   : > { %290 = vst.msk [vmem:[#allocation2 + $0x60] sm:$0xff] %vm277_vm0, %v2918_v62 }
  0x38   : > { %291 = vst.msk [vmem:[#allocation2 + $0x68] sm:$0xff] %vm277_vm0, %v2941_v33 }
  0x3b   : > { %404 = vrot.lane.b32.xlu0 %v2719_v15, %s2595_s20  ;;  %406 = vrot.lane.b32.xlu1 %v2722_v16, %s2595_s20 }
  0x3c   : > { %408 = vrot.lane.b32.xlu2 %v2729_v17, %s2595_s20 }
  0x43   : > { %410 = vrot.lane.b32.xlu0 %v2734_v18, %s2595_s20  ;;  %412 = vrot.lane.b32.xlu1 %v2737_v19, %s2595_s20 }
  0x44   : > { %414 = vrot.lane.b32.xlu2 %v2744_v20, %s2595_s20 }
  0x4b   : > { %416 = vrot.lane.b32.xlu0 %v2749_v21, %s2595_s20  ;;  %418 = vrot.lane.b32.xlu1 %v2752_v22, %s2595_s20 }
  0x4c   : > { %420 = vrot.lane.b32.xlu2 %v2759_v23, %s2595_s20 }
  0x53   : > { %422 = vrot.lane.b32.xlu0 %v2764_v24, %s2595_s20  ;;  %424 = vrot.lane.b32.xlu1 %v2767_v25, %s2595_s20 }
  0x54   : > { %426 = vrot.lane.b32.xlu2 %v2774_v26, %s2595_s20 }
  0x5b   : > { %428 = vrot.lane.b32.xlu0 %v2779_v27, %s2595_s20  ;;  %430 = vrot.lane.b32.xlu1 %v2782_v28, %s2595_s20 }
  0x5c   : > { %432 = vrot.lane.b32.xlu2 %v2789_v29, %s2595_s20 }
  0x63   : > { %434 = vrot.lane.b32.xlu0 %v2794_v30, %s2595_s20  ;;  %436 = vrot.lane.b32.xlu1 %v2797_v31, %s2595_s20  ;;  %s3790_s20 = scalar_lea.vmem %s3900_s3, %s2521_s11 }
  0x64   : > { %567 = vrot.lane.b32.xlu2 %v503_v32, %s2596_s21  ;;  %v2934_v32 = vld [vmem:[%s2647_s19 + $0xb2] sm:$0xff] }
  0x65   : > { %3944 = vst [vmem:[#allocation16_spill] sm:$0xff] %v2934_v32 }
  0x6b   : > { %569 = vrot.lane.b32.xlu0 %v504_v34, %s2596_s21  ;;  %571 = vrot.lane.b32.xlu1 %v2809_v35, %s2596_s21  ;;  %v2944_v34 = vld [vmem:[%s2647_s19 + $0xa8] sm:$0xff] }
  0x6c   : > { %573 = vrot.lane.b32.xlu2 %v2812_v36, %s2596_s21  ;;  %292 = vst.msk [vmem:[#allocation2 + $0x70] sm:$0xff] %vm277_vm0, %v2944_v34  ;;  %v3099_v36 = vld [vmem:[%s2647_s19 + $0x16a] sm:$0xff] }
  0x6d   : > { %3959 = vst [vmem:[#allocation31_spill] sm:$0xff] %v3099_v36 }
  0x6e   : > { %v383_v42 = vpop.permute.xlu2 %382 }
  0x6f   : > { %475 = vst.msk [vmem:[#allocation2 + $0x20] sm:$0xff] %vm470_vm1, %v383_v42 }
  0x73   : > { %575 = vrot.lane.b32.xlu0 %v2832_v40, %s2596_s21  ;;  %577 = vrot.lane.b32.xlu1 %v2835_v41, %s2596_s21  ;;  %v3083_v41 = vld [vmem:[%s2647_s19 + $0x140] sm:$0xff] }
  0x74   : > { %579 = vrot.lane.b32.xlu2 %v2839_v43, %s2596_s21  ;;  %v3066_v43 = vld [vmem:[%s2647_s19 + $0x142] sm:$0xff]  ;;  %305 = vst.msk [vmem:[#allocation2 + $0xd8] sm:$0xff] %vm277_vm0, %v3083_v41 }
  0x75   : > { %3956 = vst [vmem:[#allocation28_spill] sm:$0xff] %v3066_v43 }
  0x76   : > { %v385_v49 = vpop.permute.xlu2 %384 }
  0x77   : > { %476 = vst.msk [vmem:[#allocation2 + $0x28] sm:$0xff] %vm470_vm1, %v385_v49  ;;  %v2951_v49 = vld [vmem:[%s2647_s19 + $0xb0] sm:$0xff] }
  0x78   : > { %293 = vst.msk [vmem:[#allocation2 + $0x78] sm:$0xff] %vm277_vm0, %v2951_v49 }
  0x7b   : > { %581 = vrot.lane.b32.xlu0 %v2863_v47, %s2596_s21  ;;  %583 = vrot.lane.b32.xlu1 %v2866_v48, %s2596_s21  ;;  %v3050_v48 = vld [vmem:[%s2647_s19 + $0x120] sm:$0xff] }
  0x7c   : > { %585 = vrot.lane.b32.xlu2 %v2870_v50, %s2596_s21  ;;  %v3033_v50 = vld [vmem:[%s2647_s19 + $0x122] sm:$0xff]  ;;  %302 = vst.msk [vmem:[#allocation2 + $0xc0] sm:$0xff] %vm277_vm0, %v3050_v48 }
  0x7d   : > { %3953 = vst [vmem:[#allocation25_spill] sm:$0xff] %v3033_v50 }
  0x7e   : > { %v391_v56 = vpop.permute.xlu2 %390 }
  0x7f   : > { %479 = vst.msk [vmem:[#allocation2 + $0x40] sm:$0xff] %vm470_vm1, %v391_v56  ;;  %v2958_v56 = vld [vmem:[%s2647_s19 + $0xc2] sm:$0xff] }
  0x80   : > { %3945 = vst [vmem:[#allocation17_spill] sm:$0xff] %v2958_v56 }
  0x83   : > { %587 = vrot.lane.b32.xlu0 %v2894_v54, %s2596_s21  ;;  %589 = vrot.lane.b32.xlu1 %v2897_v55, %s2596_s21  ;;  %v3017_v55 = vld [vmem:[%s2647_s19 + $0xf8] sm:$0xff] }
  0x84   : > { %591 = vrot.lane.b32.xlu2 %v2901_v57, %s2596_s21  ;;  %v3000_v57 = vld [vmem:[%s2647_s19 + $0xfa] sm:$0xff]  ;;  %299 = vst.msk [vmem:[#allocation2 + $0xa8] sm:$0xff] %vm277_vm0, %v3017_v55 }
  0x85   : > { %v375_v60 = vpop.permute.xlu0 %374  ;;  %v379_v61 = vpop.permute.xlu1 %378  ;;  %3950 = vst [vmem:[#allocation22_spill] sm:$0xff] %v3000_v57 }
  0x86   : > { %471 = vst.msk [vmem:[#allocation2] sm:$0xff] %vm470_vm1, %v375_v60  ;;  %v397_v3 = vpop.permute.xlu2 %396  ;;  %v2961_v60 = vld [vmem:[%s2647_s19 + $0xca] sm:$0xff] }
  0x87   : > { %473 = vst.msk [vmem:[#allocation2 + $0x10] sm:$0xff] %vm470_vm1, %v379_v61 }
  0x88   : > { %482 = vst.msk [vmem:[#allocation2 + $0x58] sm:$0xff] %vm470_vm1, %v397_v3  ;;  %v2967_v3 = vld [vmem:[%s2647_s19 + $0xda] sm:$0xff] }
  0x89   : > { %3946 = vst [vmem:[#allocation18_spill] sm:$0xff] %v2961_v60 }
  0x8a   : > { %3947 = vst [vmem:[#allocation19_spill] sm:$0xff] %v2967_v3 }
  0x8b   : > { %593 = vrot.lane.b32.xlu0 %v2925_v63, %s2596_s21  ;;  %595 = vrot.lane.b32.xlu1 %v2928_v0, %s2596_s21  ;;  %v2984_v0 = vld [vmem:[%s2647_s19 + $0xd8] sm:$0xff] }
  0x8c   : > { %597 = vrot.lane.b32.xlu2 %v2934_v32, %s2596_s21  ;;  %296 = vst.msk [vmem:[#allocation2 + $0x90] sm:$0xff] %vm277_vm0, %v2984_v0 }
  0x8d   : > { %v377_v39 = vpop.permute.xlu0 %376  ;;  %v381_v42 = vpop.permute.xlu1 %380 }
  0x8e   : > { %472 = vst.msk [vmem:[#allocation2 + $0x8] sm:$0xff] %vm470_vm1, %v377_v39  ;;  %v403_v61 = vpop.permute.xlu2 %402  ;;  %v2974_v39 = vld [vmem:[%s2647_s19 + $0xc0] sm:$0xff] }
  0x8f   : > { %474 = vst.msk [vmem:[#allocation2 + $0x18] sm:$0xff] %vm470_vm1, %v381_v42  ;;  %v2977_v42 = vld [vmem:[%s2647_s19 + $0xc8] sm:$0xff] }
  0x90   : > { %485 = vst.msk [vmem:[#allocation2 + $0x70] sm:$0xff] %vm470_vm1, %v403_v61 }
  0x91   : > { %294 = vst.msk [vmem:[#allocation2 + $0x80] sm:$0xff] %vm277_vm0, %v2974_v39 }
  0x92   : > { %295 = vst.msk [vmem:[#allocation2 + $0x88] sm:$0xff] %vm277_vm0, %v2977_v42 }
  0x93   : > { %599 = vrot.lane.b32.xlu0 %v2958_v56, %s2596_s21  ;;  %601 = vrot.lane.b32.xlu1 %v2961_v60, %s2596_s21  ;;  %v2991_v60 = vld [vmem:[%s2647_s19 + $0xe2] sm:$0xff]  ;;  %v2994_v56 = vld [vmem:[%s2647_s19 + $0xf2] sm:$0xff] }
  0x94   : > { %603 = vrot.lane.b32.xlu2 %v2967_v3, %s2596_s21  ;;  %3948 = vst [vmem:[#allocation20_spill] sm:$0xff] %v2991_v60 }
  0x95   : > { %v387_v32 = vpop.permute.xlu0 %386  ;;  %v389_v61 = vpop.permute.xlu1 %388  ;;  %3949 = vst [vmem:[#allocation21_spill] sm:$0xff] %v2994_v56 }
  0x96   : > { %477 = vst.msk [vmem:[#allocation2 + $0x30] sm:$0xff] %vm470_vm1, %v387_v32  ;;  %v409_v63 = vpop.permute.xlu2 %408  ;;  %v3007_v32 = vld [vmem:[%s2647_s19 + $0xe0] sm:$0xff] }
  0x97   : > { %478 = vst.msk [vmem:[#allocation2 + $0x38] sm:$0xff] %vm470_vm1, %v389_v61  ;;  %v3010_v61 = vld [vmem:[%s2647_s19 + $0xf0] sm:$0xff] }
  0x98   : > { %488 = vst.msk [vmem:[#allocation2 + $0x88] sm:$0xff] %vm470_vm1, %v409_v63 }
  0x99   : > { %297 = vst.msk [vmem:[#allocation2 + $0x98] sm:$0xff] %vm277_vm0, %v3007_v32 }
  0x9a   : > { %298 = vst.msk [vmem:[#allocation2 + $0xa0] sm:$0xff] %vm277_vm0, %v3010_v61 }
  0x9b   : > { %605 = vrot.lane.b32.xlu0 %v2991_v60, %s2596_s21  ;;  %607 = vrot.lane.b32.xlu1 %v2994_v56, %s2596_s21  ;;  %v3024_v56 = vld [vmem:[%s2647_s19 + $0x10a] sm:$0xff]  ;;  %v3027_v60 = vld [vmem:[%s2647_s19 + $0x112] sm:$0xff] }
  0x9c   : > { %609 = vrot.lane.b32.xlu2 %v3000_v57, %s2596_s21  ;;  %3951 = vst [vmem:[#allocation23_spill] sm:$0xff] %v3024_v56 }
  0x9d   : > { %v393_v3 = vpop.permute.xlu0 %392  ;;  %v395_v63 = vpop.permute.xlu1 %394  ;;  %3952 = vst [vmem:[#allocation24_spill] sm:$0xff] %v3027_v60 }
  0x9e   : > { %480 = vst.msk [vmem:[#allocation2 + $0x48] sm:$0xff] %vm470_vm1, %v393_v3  ;;  %v415_v54 = vpop.permute.xlu2 %414  ;;  %v3040_v3 = vld [vmem:[%s2647_s19 + $0x108] sm:$0xff] }
  0x9f   : > { %481 = vst.msk [vmem:[#allocation2 + $0x50] sm:$0xff] %vm470_vm1, %v395_v63  ;;  %v3043_v63 = vld [vmem:[%s2647_s19 + $0x110] sm:$0xff] }
  0xa0   : > { %491 = vst.msk [vmem:[#allocation2 + $0xa0] sm:$0xff] %vm470_vm1, %v415_v54 }
  0xa1   : > { %300 = vst.msk [vmem:[#allocation2 + $0xb0] sm:$0xff] %vm277_vm0, %v3040_v3 }
  0xa2   : > { %301 = vst.msk [vmem:[#allocation2 + $0xb8] sm:$0xff] %vm277_vm0, %v3043_v63 }
  0xa3   : > { %611 = vrot.lane.b32.xlu0 %v3024_v56, %s2596_s21  ;;  %613 = vrot.lane.b32.xlu1 %v3027_v60, %s2596_s21  ;;  %v3057_v60 = vld [vmem:[%s2647_s19 + $0x12a] sm:$0xff]  ;;  %v3060_v56 = vld [vmem:[%s2647_s19 + $0x13a] sm:$0xff] }
  0xa4   : > { %615 = vrot.lane.b32.xlu2 %v3033_v50, %s2596_s21  ;;  %3954 = vst [vmem:[#allocation26_spill] sm:$0xff] %v3057_v60 }
  0xa5   : > { %v399_v57 = vpop.permute.xlu0 %398  ;;  %v401_v54 = vpop.permute.xlu1 %400  ;;  %3955 = vst [vmem:[#allocation27_spill] sm:$0xff] %v3060_v56 }
  0xa6   : > { %483 = vst.msk [vmem:[#allocation2 + $0x60] sm:$0xff] %vm470_vm1, %v399_v57  ;;  %v421_v47 = vpop.permute.xlu2 %420  ;;  %v3073_v57 = vld [vmem:[%s2647_s19 + $0x128] sm:$0xff] }
  0xa7   : > { %484 = vst.msk [vmem:[#allocation2 + $0x68] sm:$0xff] %vm470_vm1, %v401_v54  ;;  %v3076_v54 = vld [vmem:[%s2647_s19 + $0x138] sm:$0xff] }
  0xa8   : > { %494 = vst.msk [vmem:[#allocation2 + $0xb8] sm:$0xff] %vm470_vm1, %v421_v47 }
  0xa9   : > { %303 = vst.msk [vmem:[#allocation2 + $0xc8] sm:$0xff] %vm277_vm0, %v3073_v57 }
  0xaa   : > { %304 = vst.msk [vmem:[#allocation2 + $0xd0] sm:$0xff] %vm277_vm0, %v3076_v54 }
  0xab   : > { %617 = vrot.lane.b32.xlu0 %v3057_v60, %s2596_s21  ;;  %619 = vrot.lane.b32.xlu1 %v3060_v56, %s2596_s21  ;;  %v3090_v56 = vld [vmem:[%s2647_s19 + $0x152] sm:$0xff]  ;;  %v3093_v60 = vld [vmem:[%s2647_s19 + $0x15a] sm:$0xff] }
  0xac   : > { %621 = vrot.lane.b32.xlu2 %v3066_v43, %s2596_s21  ;;  %3957 = vst [vmem:[#allocation29_spill] sm:$0xff] %v3090_v56 }
  0xad   : > { %v405_v50 = vpop.permute.xlu0 %404  ;;  %v407_v47 = vpop.permute.xlu1 %406  ;;  %3958 = vst [vmem:[#allocation30_spill] sm:$0xff] %v3093_v60 }
  0xae   : > { %486 = vst.msk [vmem:[#allocation2 + $0x78] sm:$0xff] %vm470_vm1, %v405_v50  ;;  %v427_v40 = vpop.permute.xlu2 %426  ;;  %v3106_v50 = vld [vmem:[%s2647_s19 + $0x150] sm:$0xff] }
  0xaf   : > { %487 = vst.msk [vmem:[#allocation2 + $0x80] sm:$0xff] %vm470_vm1, %v407_v47  ;;  %v3109_v47 = vld [vmem:[%s2647_s19 + $0x158] sm:$0xff] }
  0xb0   : > { %497 = vst.msk [vmem:[#allocation2 + $0xd0] sm:$0xff] %vm470_vm1, %v427_v40  ;;  %v3116_v40 = vld [vmem:[%s2647_s19 + $0x168] sm:$0xff] }
  0xb1   : > { %306 = vst.msk [vmem:[#allocation2 + $0xe0] sm:$0xff] %vm277_vm0, %v3106_v50 }
  0xb2   : > { %307 = vst.msk [vmem:[#allocation2 + $0xe8] sm:$0xff] %vm277_vm0, %v3109_v47 }
  0xb3   : > { %623 = vrot.lane.b32.xlu0 %v3090_v56, %s2596_s21  ;;  %625 = vrot.lane.b32.xlu1 %v3093_v60, %s2596_s21  ;;  %v3123_v60 = vld [vmem:[%s2647_s19 + $0x172] sm:$0xff]  ;;  %308 = vst.msk [vmem:[#allocation2 + $0xf0] sm:$0xff] %vm277_vm0, %v3116_v40 }
  0xb4   : > { %627 = vrot.lane.b32.xlu2 %v3099_v36, %s2596_s21  ;;  %3960 = vst [vmem:[#allocation32_spill] sm:$0xff] %v3123_v60 }
  0xb5   : > { %v411_v43 = vpop.permute.xlu0 %410  ;;  %v413_v35 = vpop.permute.xlu1 %412 }
  0xb6   : > { %489 = vst.msk [vmem:[#allocation2 + $0x90] sm:$0xff] %vm470_vm1, %v411_v43  ;;  %v433_v56 = vpop.permute.xlu2 %432  ;;  %v3133_v43 = vld [vmem:[%s2647_s19 + $0x170] sm:$0xff] }
  0xb7   : > { %490 = vst.msk [vmem:[#allocation2 + $0x98] sm:$0xff] %vm470_vm1, %v413_v35 }
  0xb8   : > { %500 = vst.msk [vmem:[#allocation2 + $0xe8] sm:$0xff] %vm470_vm1, %v433_v56 }
  0xb9   : > { %309 = vst.msk [vmem:[#allocation2 + $0xf8] sm:$0xff] %vm277_vm0, %v3133_v43 }
  0xbb   : > { %629 = vrot.lane.b32.xlu0 %v3123_v60, %s2596_s21  ;;  %763 = vrot.lane.b32.xlu1 %v2818_v37, %s2597_s22 }
  0xbc   : > { %765 = vrot.lane.b32.xlu2 %v2846_v44, %s2597_s22 }
  0xbd   : > { %v417_v35 = vpop.permute.xlu0 %416  ;;  %v419_v36 = vpop.permute.xlu1 %418 }
  0xbe   : > { %492 = vst.msk [vmem:[#allocation2 + $0xa8] sm:$0xff] %vm470_vm1, %v417_v35  ;;  %v568_v56 = vpop.permute.xlu2 %567 }
  0xbf   : > { %493 = vst.msk [vmem:[#allocation2 + $0xb0] sm:$0xff] %vm470_vm1, %v419_v36 }
  0xc0   : > { %664 = vst.msk [vmem:[#allocation2] sm:$0xff] %vm663_vm2, %v568_v56 }
  0xc3   : > { %767 = vrot.lane.b32.xlu0 %v2821_v38, %s2597_s22  ;;  %769 = vrot.lane.b32.xlu1 %v2849_v45, %s2597_s22 }
  0xc4   : > { %771 = vrot.lane.b32.xlu2 %v2854_v46, %s2597_s22 }
  0xc5   : > { %v423_v37 = vpop.permute.xlu0 %422  ;;  %v425_v60 = vpop.permute.xlu1 %424 }
  0xc6   : > { %495 = vst.msk [vmem:[#allocation2 + $0xc0] sm:$0xff] %vm470_vm1, %v423_v37  ;;  %v574_v44 = vpop.permute.xlu2 %573 }
  0xc7   : > { %496 = vst.msk [vmem:[#allocation2 + $0xc8] sm:$0xff] %vm470_vm1, %v425_v60 }
  0xc8   : > { %667 = vst.msk [vmem:[#allocation2 + $0x18] sm:$0xff] %vm663_vm2, %v574_v44 }
  0xcb   : > { %773 = vrot.lane.b32.xlu0 %v2877_v51, %s2597_s22  ;;  %775 = vrot.lane.b32.xlu1 %v2880_v52, %s2597_s22 }
  0xcc   : > { %777 = vrot.lane.b32.xlu2 %v2885_v53, %s2597_s22 }
  0xcd   : > { %v429_v36 = vpop.permute.xlu0 %428  ;;  %v431_v38 = vpop.permute.xlu1 %430 }
  0xce   : > { %498 = vst.msk [vmem:[#allocation2 + $0xd8] sm:$0xff] %vm470_vm1, %v429_v36  ;;  %v580_v45 = vpop.permute.xlu2 %579 }
  0xcf   : > { %499 = vst.msk [vmem:[#allocation2 + $0xe0] sm:$0xff] %vm470_vm1, %v431_v38 }
  0xd0   : > { %670 = vst.msk [vmem:[#allocation2 + $0x30] sm:$0xff] %vm663_vm2, %v580_v45 }
  0xd3   : > { %779 = vrot.lane.b32.xlu0 %v2908_v58, %s2597_s22  ;;  %781 = vrot.lane.b32.xlu1 %v2911_v59, %s2597_s22 }
  0xd4   : > { %783 = vrot.lane.b32.xlu2 %v2918_v62, %s2597_s22 }
  0xd5   : > { %v435_v60 = vpop.permute.xlu0 %434  ;;  %v437_v52 = vpop.permute.xlu1 %436 }
  0xd6   : > { %501 = vst.msk [vmem:[#allocation2 + $0xf0] sm:$0xff] %vm470_vm1, %v435_v60  ;;  %v586_v35 = vpop.permute.xlu2 %585 }
  0xd7   : > { %502 = vst.msk [vmem:[#allocation2 + $0xf8] sm:$0xff] %vm470_vm1, %v437_v52 }
  0xd8   : > { %673 = vst.msk [vmem:[#allocation2 + $0x48] sm:$0xff] %vm663_vm2, %v586_v35  ;;  %v3228_v35 = vld [vmem:[%s2647_s19 + $0x188] sm:$0xff] }
  0xdb   : > { %785 = vrot.lane.b32.xlu0 %v2941_v33, %s2597_s22  ;;  %787 = vrot.lane.b32.xlu1 %v2944_v34, %s2597_s22 }
  0xdc   : > { %789 = vrot.lane.b32.xlu2 %v2951_v49, %s2597_s22 }
  0xdd   : > { %v570_v56 = vpop.permute.xlu0 %569  ;;  %v572_v59 = vpop.permute.xlu1 %571 }
  0xde   : > { %665 = vst.msk [vmem:[#allocation2 + $0x8] sm:$0xff] %vm663_vm2, %v570_v56  ;;  %v592_v37 = vpop.permute.xlu2 %591 }
  0xdf   : > { %666 = vst.msk [vmem:[#allocation2 + $0x10] sm:$0xff] %vm663_vm2, %v572_v59 }
  0xe0   : > { %676 = vst.msk [vmem:[#allocation2 + $0x60] sm:$0xff] %vm663_vm2, %v592_v37 }
  0xe3   : > { %791 = vrot.lane.b32.xlu0 %v2974_v39, %s2597_s22  ;;  %793 = vrot.lane.b32.xlu1 %v2977_v42, %s2597_s22 }
  0xe4   : > { %795 = vrot.lane.b32.xlu2 %v2984_v0, %s2597_s22 }
  0xe5   : > { %v576_v44 = vpop.permute.xlu0 %575  ;;  %v578_v34 = vpop.permute.xlu1 %577 }
  0xe6   : > { %668 = vst.msk [vmem:[#allocation2 + $0x20] sm:$0xff] %vm663_vm2, %v576_v44  ;;  %v598_v36 = vpop.permute.xlu2 %597 }
  0xe7   : > { %669 = vst.msk [vmem:[#allocation2 + $0x28] sm:$0xff] %vm663_vm2, %v578_v34 }
  0xe8   : > { %679 = vst.msk [vmem:[#allocation2 + $0x78] sm:$0xff] %vm663_vm2, %v598_v36  ;;  %v3328_v36 = vld [vmem:[%s2647_s19 + $0x189] sm:$0xff] }
  0xeb   : > { %797 = vrot.lane.b32.xlu0 %v3007_v32, %s2597_s22  ;;  %799 = vrot.lane.b32.xlu1 %v3010_v61, %s2597_s22 }
  0xec   : > { %801 = vrot.lane.b32.xlu2 %v3017_v55, %s2597_s22 }
  0xed   : > { %v582_v38 = vpop.permute.xlu0 %581  ;;  %v584_v42 = vpop.permute.xlu1 %583 }
  0xee   : > { %671 = vst.msk [vmem:[#allocation2 + $0x38] sm:$0xff] %vm663_vm2, %v582_v38  ;;  %v604_v45 = vpop.permute.xlu2 %603 }
  0xef   : > { %672 = vst.msk [vmem:[#allocation2 + $0x40] sm:$0xff] %vm663_vm2, %v584_v42 }
  0xf0   : > { %682 = vst.msk [vmem:[#allocation2 + $0x90] sm:$0xff] %vm663_vm2, %v604_v45  ;;  %v3962_v45 = vld [vmem:[#allocation4_spill] sm:$0xff] }
  0xf3   : > { %803 = vrot.lane.b32.xlu0 %v3040_v3, %s2597_s22  ;;  %805 = vrot.lane.b32.xlu1 %v3043_v63, %s2597_s22 }
  0xf4   : > { %807 = vrot.lane.b32.xlu2 %v3050_v48, %s2597_s22 }
  0xf5   : > { %v588_v60 = vpop.permute.xlu0 %587  ;;  %v590_v61 = vpop.permute.xlu1 %589 }
  0xf6   : > { %674 = vst.msk [vmem:[#allocation2 + $0x50] sm:$0xff] %vm663_vm2, %v588_v60  ;;  %v610_v55 = vpop.permute.xlu2 %609  ;;  %v3963_v60 = vld [vmem:[#allocation5_spill] sm:$0xff] }
  0xf7   : > { %675 = vst.msk [vmem:[#allocation2 + $0x58] sm:$0xff] %vm663_vm2, %v590_v61 }
  0xf8   : > { %685 = vst.msk [vmem:[#allocation2 + $0xa8] sm:$0xff] %vm663_vm2, %v610_v55 }
  0xfb   : > { %809 = vrot.lane.b32.xlu0 %v3073_v57, %s2597_s22  ;;  %811 = vrot.lane.b32.xlu1 %v3076_v54, %s2597_s22 }
  0xfc   : > { %813 = vrot.lane.b32.xlu2 %v3083_v41, %s2597_s22  ;;  %v2324_v41 = vld [vmem:[%s2647_s19 + $0x180] sm:$0xff] }
  0xfd   : > { %v594_v3 = vpop.permute.xlu0 %593  ;;  %v596_v63 = vpop.permute.xlu1 %595 }
  0xfe   : > { %677 = vst.msk [vmem:[#allocation2 + $0x68] sm:$0xff] %vm663_vm2, %v594_v3  ;;  %v616_v48 = vpop.permute.xlu2 %615  ;;  %v3964_v3 = vld [vmem:[#allocation6_spill] sm:$0xff] }
  0xff   : > { %678 = vst.msk [vmem:[#allocation2 + $0x70] sm:$0xff] %vm663_vm2, %v596_v63 }
 0x100   : > { %688 = vst.msk [vmem:[#allocation2 + $0xc0] sm:$0xff] %vm663_vm2, %v616_v48  ;;  %v3965_v48 = vld [vmem:[#allocation7_spill] sm:$0xff] }
 0x103   : > { %815 = vrot.lane.b32.xlu0 %v3106_v50, %s2597_s22  ;;  %817 = vrot.lane.b32.xlu1 %v3109_v47, %s2597_s22 }
 0x104   : > { %819 = vrot.lane.b32.xlu2 %v3116_v40, %s2597_s22 }
 0x105   : > { %v600_v57 = vpop.permute.xlu0 %599  ;;  %v602_v54 = vpop.permute.xlu1 %601 }
 0x106   : > { %680 = vst.msk [vmem:[#allocation2 + $0x80] sm:$0xff] %vm663_vm2, %v600_v57  ;;  %v622_v52 = vpop.permute.xlu2 %621  ;;  %v3966_v57 = vld [vmem:[#allocation8_spill] sm:$0xff] }
 0x107   : > { %681 = vst.msk [vmem:[#allocation2 + $0x88] sm:$0xff] %vm663_vm2, %v602_v54 }
 0x108   : > { %691 = vst.msk [vmem:[#allocation2 + $0xd8] sm:$0xff] %vm663_vm2, %v622_v52  ;;  %v3967_v52 = vld [vmem:[#allocation9_spill] sm:$0xff] }
 0x10b   : > { %821 = vrot.lane.b32.xlu0 %v3133_v43, %s2597_s22  ;;  %823 = vrot.lane.b32.xlu1 %v2324_v41, %s2597_s22 }
 0x10c   : > { %825 = vrot.lane.b32.xlu2 %v3228_v35, %s2597_s22 }
 0x10d   : > { %v606_v56 = vpop.permute.xlu0 %605  ;;  %v608_v59 = vpop.permute.xlu1 %607 }
 0x10e   : > { %683 = vst.msk [vmem:[#allocation2 + $0x98] sm:$0xff] %vm663_vm2, %v606_v56  ;;  %v628_v37 = vpop.permute.xlu2 %627 }
 0x10f   : > { %684 = vst.msk [vmem:[#allocation2 + $0xa0] sm:$0xff] %vm663_vm2, %v608_v59  ;;  %v3968_v59 = vld [vmem:[#allocation10_spill] sm:$0xff] }
 0x110   : > { %694 = vst.msk [vmem:[#allocation2 + $0xf0] sm:$0xff] %vm663_vm2, %v628_v37  ;;  %v3969_v37 = vld [vmem:[#allocation11_spill] sm:$0xff] }
 0x113   : > { %956 = vrot.lane.b32.xlu0 %v2651_v1, %s2598_s23  ;;  %958 = vrot.lane.b32.xlu1 %v2663_v4, %s2598_s23 }
 0x114   : > { %960 = vrot.lane.b32.xlu2 %v2657_v2, %s2598_s23 }
 0x115   : > { %v612_v43 = vpop.permute.xlu0 %611  ;;  %v614_v44 = vpop.permute.xlu1 %613 }
 0x116   : > { %686 = vst.msk [vmem:[#allocation2 + $0xb0] sm:$0xff] %vm663_vm2, %v612_v43  ;;  %v766_v34 = vpop.permute.xlu2 %765 }
 0x117   : > { %687 = vst.msk [vmem:[#allocation2 + $0xb8] sm:$0xff] %vm663_vm2, %v614_v44 }
 0x118   : > { %861 = vst.msk [vmem:[#allocation2 + $0x8] sm:$0xff] %vm859_vm3, %v766_v34  ;;  %v3970_v34 = vld [vmem:[#allocation12_spill] sm:$0xff] }
 0x11b   : > { %962 = vrot.lane.b32.xlu0 %v2669_v5, %s2598_s23  ;;  %964 = vrot.lane.b32.xlu1 %v2674_v6, %s2598_s23 }
 0x11c   : > { %966 = vrot.lane.b32.xlu2 %v2677_v7, %s2598_s23 }
 0x11d   : > { %v618_v1 = vpop.permute.xlu0 %617  ;;  %v620_v4 = vpop.permute.xlu1 %619 }
 0x11e   : > { %689 = vst.msk [vmem:[#allocation2 + $0xc8] sm:$0xff] %vm663_vm2, %v618_v1  ;;  %v772_v2 = vpop.permute.xlu2 %771 }
 0x11f   : > { %690 = vst.msk [vmem:[#allocation2 + $0xd0] sm:$0xff] %vm663_vm2, %v620_v4  ;;  %v3971_v4 = vld [vmem:[#allocation13_spill] sm:$0xff] }
 0x120   : > { %864 = vst.msk [vmem:[#allocation2 + $0x20] sm:$0xff] %vm859_vm3, %v772_v2  ;;  %v3972_v2 = vld [vmem:[#allocation14_spill] sm:$0xff] }
 0x123   : > { %968 = vrot.lane.b32.xlu0 %v2684_v8, %s2598_s23  ;;  %970 = vrot.lane.b32.xlu1 %v2689_v9, %s2598_s23 }
 0x124   : > { %972 = vrot.lane.b32.xlu2 %v2692_v10, %s2598_s23 }
 0x125   : > { %v624_v5 = vpop.permute.xlu0 %623  ;;  %v626_v6 = vpop.permute.xlu1 %625 }
 0x126   : > { %692 = vst.msk [vmem:[#allocation2 + $0xe0] sm:$0xff] %vm663_vm2, %v624_v5  ;;  %v778_v7 = vpop.permute.xlu2 %777 }
 0x127   : > { %693 = vst.msk [vmem:[#allocation2 + $0xe8] sm:$0xff] %vm663_vm2, %v626_v6 }
 0x128   : > { %867 = vst.msk [vmem:[#allocation2 + $0x38] sm:$0xff] %vm859_vm3, %v778_v7  ;;  %v3973_v7 = vld [vmem:[#allocation15_spill] sm:$0xff] }
 0x12b   : > { %974 = vrot.lane.b32.xlu0 %v2699_v11, %s2598_s23  ;;  %976 = vrot.lane.b32.xlu1 %v2704_v12, %s2598_s23 }
 0x12c   : > { %978 = vrot.lane.b32.xlu2 %v2707_v13, %s2598_s23 }
 0x12d   : > { %v630_v8 = vpop.permute.xlu0 %629  ;;  %v764_v9 = vpop.permute.xlu1 %763 }
 0x12e   : > { %695 = vst.msk [vmem:[#allocation2 + $0xf8] sm:$0xff] %vm663_vm2, %v630_v8  ;;  %v784_v10 = vpop.permute.xlu2 %783 }
 0x12f   : > { %860 = vst.msk [vmem:[#allocation2] sm:$0xff] %vm859_vm3, %v764_v9  ;;  %v3974_v9 = vld [vmem:[#allocation16_spill] sm:$0xff] }
 0x130   : > { %870 = vst.msk [vmem:[#allocation2 + $0x50] sm:$0xff] %vm859_vm3, %v784_v10  ;;  %v3975_v10 = vld [vmem:[#allocation17_spill] sm:$0xff] }
 0x133   : > { %980 = vrot.lane.b32.xlu0 %v2714_v14, %s2598_s23  ;;  %982 = vrot.lane.b32.xlu1 %v2719_v15, %s2598_s23 }
 0x134   : > { %984 = vrot.lane.b32.xlu2 %v2722_v16, %s2598_s23 }
 0x135   : > { %v768_v11 = vpop.permute.xlu0 %767  ;;  %v770_v12 = vpop.permute.xlu1 %769 }
 0x136   : > { %862 = vst.msk [vmem:[#allocation2 + $0x10] sm:$0xff] %vm859_vm3, %v768_v11  ;;  %v790_v13 = vpop.permute.xlu2 %789 }
 0x137   : > { %863 = vst.msk [vmem:[#allocation2 + $0x18] sm:$0xff] %vm859_vm3, %v770_v12 }
 0x138   : > { %873 = vst.msk [vmem:[#allocation2 + $0x68] sm:$0xff] %vm859_vm3, %v790_v13  ;;  %v3976_v13 = vld [vmem:[#allocation18_spill] sm:$0xff] }
 0x13b   : > { %986 = vrot.lane.b32.xlu0 %v2729_v17, %s2598_s23  ;;  %988 = vrot.lane.b32.xlu1 %v2734_v18, %s2598_s23 }
 0x13c   : > { %990 = vrot.lane.b32.xlu2 %v2737_v19, %s2598_s23 }
 0x13d   : > { %v774_v14 = vpop.permute.xlu0 %773  ;;  %v776_v15 = vpop.permute.xlu1 %775 }
 0x13e   : > { %865 = vst.msk [vmem:[#allocation2 + $0x28] sm:$0xff] %vm859_vm3, %v774_v14  ;;  %v796_v16 = vpop.permute.xlu2 %795 }
 0x13f   : > { %866 = vst.msk [vmem:[#allocation2 + $0x30] sm:$0xff] %vm859_vm3, %v776_v15  ;;  %v3977_v15 = vld [vmem:[#allocation19_spill] sm:$0xff] }
 0x140   : > { %876 = vst.msk [vmem:[#allocation2 + $0x80] sm:$0xff] %vm859_vm3, %v796_v16  ;;  %v3978_v16 = vld [vmem:[#allocation20_spill] sm:$0xff] }
 0x143   : > { %992 = vrot.lane.b32.xlu0 %v2744_v20, %s2598_s23  ;;  %994 = vrot.lane.b32.xlu1 %v2749_v21, %s2598_s23 }
 0x144   : > { %996 = vrot.lane.b32.xlu2 %v2752_v22, %s2598_s23 }
 0x145   : > { %v780_v17 = vpop.permute.xlu0 %779  ;;  %v782_v18 = vpop.permute.xlu1 %781 }
 0x146   : > { %868 = vst.msk [vmem:[#allocation2 + $0x40] sm:$0xff] %vm859_vm3, %v780_v17  ;;  %v802_v19 = vpop.permute.xlu2 %801 }
 0x147   : > { %869 = vst.msk [vmem:[#allocation2 + $0x48] sm:$0xff] %vm859_vm3, %v782_v18 }
 0x148   : > { %879 = vst.msk [vmem:[#allocation2 + $0x98] sm:$0xff] %vm859_vm3, %v802_v19  ;;  %v3979_v19 = vld [vmem:[#allocation21_spill] sm:$0xff] }
 0x14b   : > { %998 = vrot.lane.b32.xlu0 %v2759_v23, %s2598_s23  ;;  %1000 = vrot.lane.b32.xlu1 %v2764_v24, %s2598_s23 }
 0x14c   : > { %1002 = vrot.lane.b32.xlu2 %v2767_v25, %s2598_s23 }
 0x14d   : > { %v786_v20 = vpop.permute.xlu0 %785  ;;  %v788_v21 = vpop.permute.xlu1 %787 }
 0x14e   : > { %871 = vst.msk [vmem:[#allocation2 + $0x58] sm:$0xff] %vm859_vm3, %v786_v20  ;;  %v808_v22 = vpop.permute.xlu2 %807 }
 0x14f   : > { %872 = vst.msk [vmem:[#allocation2 + $0x60] sm:$0xff] %vm859_vm3, %v788_v21  ;;  %v3980_v21 = vld [vmem:[#allocation22_spill] sm:$0xff] }
 0x150   : > { %882 = vst.msk [vmem:[#allocation2 + $0xb0] sm:$0xff] %vm859_vm3, %v808_v22  ;;  %v3981_v22 = vld [vmem:[#allocation23_spill] sm:$0xff] }
 0x153   : > { %1004 = vrot.lane.b32.xlu0 %v2774_v26, %s2598_s23  ;;  %1006 = vrot.lane.b32.xlu1 %v2779_v27, %s2598_s23 }
 0x154   : > { %1008 = vrot.lane.b32.xlu2 %v2782_v28, %s2598_s23  ;;  %v3325_v28 = vld [vmem:[%s2647_s19 + $0x181] sm:$0xff] }
 0x155   : > { %v792_v23 = vpop.permute.xlu0 %791  ;;  %v794_v24 = vpop.permute.xlu1 %793 }
 0x156   : > { %874 = vst.msk [vmem:[#allocation2 + $0x70] sm:$0xff] %vm859_vm3, %v792_v23  ;;  %v814_v25 = vpop.permute.xlu2 %813 }
 0x157   : > { %875 = vst.msk [vmem:[#allocation2 + $0x78] sm:$0xff] %vm859_vm3, %v794_v24 }
 0x158   : > { %885 = vst.msk [vmem:[#allocation2 + $0xc8] sm:$0xff] %vm859_vm3, %v814_v25  ;;  %v3982_v25 = vld [vmem:[#allocation24_spill] sm:$0xff] }
 0x15b   : > { %1010 = vrot.lane.b32.xlu0 %v2789_v29, %s2598_s23  ;;  %1012 = vrot.lane.b32.xlu1 %v2794_v30, %s2598_s23 }
 0x15c   : > { %1014 = vrot.lane.b32.xlu2 %v2797_v31, %s2598_s23  ;;  %v3961_v31 = vld [vmem:[#allocation3_spill] sm:$0xff] }
 0x15d   : > { %v798_v26 = vpop.permute.xlu0 %797  ;;  %v800_v27 = vpop.permute.xlu1 %799 }
 0x15e   : > { %877 = vst.msk [vmem:[#allocation2 + $0x88] sm:$0xff] %vm859_vm3, %v798_v26  ;;  %v820_v38 = vpop.permute.xlu2 %819 }
 0x15f   : > { %878 = vst.msk [vmem:[#allocation2 + $0x90] sm:$0xff] %vm859_vm3, %v800_v27  ;;  %v3983_v27 = vld [vmem:[#allocation25_spill] sm:$0xff] }
 0x160   : > { %888 = vst.msk [vmem:[#allocation2 + $0xe0] sm:$0xff] %vm859_vm3, %v820_v38  ;;  %v3984_v38 = vld [vmem:[#allocation26_spill] sm:$0xff] }
 0x163   : > { %1016 = vrot.lane.b32.xlu0 %v3325_v28, %s2598_s23  ;;  %1018 = vrot.lane.b32.xlu1 %v3328_v36, %s2598_s23 }
 0x164   : > { %1149 = vrot.lane.b32.xlu2 %v3961_v31, %s2599_s24  ;;  %v3985_v31 = vld [vmem:[#allocation27_spill] sm:$0xff] }
 0x165   : > { %v804_v29 = vpop.permute.xlu0 %803  ;;  %v806_v30 = vpop.permute.xlu1 %805 }
 0x166   : > { %880 = vst.msk [vmem:[#allocation2 + $0xa0] sm:$0xff] %vm859_vm3, %v804_v29  ;;  %v826_v42 = vpop.permute.xlu2 %825 }
 0x167   : > { %881 = vst.msk [vmem:[#allocation2 + $0xa8] sm:$0xff] %vm859_vm3, %v806_v30 }
 0x168   : > { %891 = vst.msk [vmem:[#allocation2 + $0xf8] sm:$0xff] %vm859_vm3, %v826_v42 }
 0x16b   : > { %1151 = vrot.lane.b32.xlu0 %v3962_v45, %s2599_s24  ;;  %1153 = vrot.lane.b32.xlu1 %v3963_v60, %s2599_s24  ;;  %v3986_v45 = vld [vmem:[#allocation28_spill] sm:$0xff]  ;;  %v3987_v60 = vld [vmem:[#allocation29_spill] sm:$0xff] }
 0x16c   : > { %1155 = vrot.lane.b32.xlu2 %v3964_v3, %s2599_s24  ;;  %v3988_v3 = vld [vmem:[#allocation30_spill] sm:$0xff] }
 0x16d   : > { %v810_v61 = vpop.permute.xlu0 %809  ;;  %v812_v55 = vpop.permute.xlu1 %811 }
 0x16e   : > { %883 = vst.msk [vmem:[#allocation2 + $0xb8] sm:$0xff] %vm859_vm3, %v810_v61  ;;  %v961_v63 = vpop.permute.xlu2 %960 }
 0x16f   : > { %884 = vst.msk [vmem:[#allocation2 + $0xc0] sm:$0xff] %vm859_vm3, %v812_v55 }
 0x170   : > { %1055 = vst.msk [vmem:[#allocation2 + $0x10] sm:$0xff] %vm1052_vm4, %v961_v63 }
 0x173   : > { %1157 = vrot.lane.b32.xlu0 %v3965_v48, %s2599_s24  ;;  %1159 = vrot.lane.b32.xlu1 %v3966_v57, %s2599_s24  ;;  %v3989_v48 = vld [vmem:[#allocation31_spill] sm:$0xff]  ;;  %v3990_v57 = vld [vmem:[#allocation32_spill] sm:$0xff] }
 0x174   : > { %1161 = vrot.lane.b32.xlu2 %v3967_v52, %s2599_s24 }
 0x175   : > { %v816_v54 = vpop.permute.xlu0 %815  ;;  %v818_v41 = vpop.permute.xlu1 %817 }
 0x176   : > { %886 = vst.msk [vmem:[#allocation2 + $0xd0] sm:$0xff] %vm859_vm3, %v816_v54  ;;  %v967_v56 = vpop.permute.xlu2 %966  ;;  %v3426_v54 = vld [vmem:[%s2647_s19 + $0x182] sm:$0xff] }
 0x177   : > { %887 = vst.msk [vmem:[#allocation2 + $0xd8] sm:$0xff] %vm859_vm3, %v818_v41 }
 0x178   : > { %1058 = vst.msk [vmem:[#allocation2 + $0x28] sm:$0xff] %vm1052_vm4, %v967_v56  ;;  %v3433_v56 = vld [vmem:[%s2647_s19 + $0x18a] sm:$0xff] }
 0x17b   : > { %1163 = vrot.lane.b32.xlu0 %v3968_v59, %s2599_s24  ;;  %1165 = vrot.lane.b32.xlu1 %v3969_v37, %s2599_s24  ;;  %v2390_v59 = vld [vmem:[%s2647_s19 + $0x30] sm:$0xff] }
 0x17c   : > { %1167 = vrot.lane.b32.xlu2 %v3970_v34, %s2599_s24 }
 0x17d   : > { %v822_v43 = vpop.permute.xlu0 %821  ;;  %v824_v44 = vpop.permute.xlu1 %823 }
 0x17e   : > { %889 = vst.msk [vmem:[#allocation2 + $0xe8] sm:$0xff] %vm859_vm3, %v822_v43  ;;  %v973_v1 = vpop.permute.xlu2 %972  ;;  %v2391_v43 = vld [vmem:[%s2647_s19 + $0x38] sm:$0xff] }
 0x17f   : > { %890 = vst.msk [vmem:[#allocation2 + $0xf0] sm:$0xff] %vm859_vm3, %v824_v44 }
 0x180   : > { %1061 = vst.msk [vmem:[#allocation2 + $0x40] sm:$0xff] %vm1052_vm4, %v973_v1 }
 0x183   : > { %1169 = vrot.lane.b32.xlu0 %v3971_v4, %s2599_s24  ;;  %1171 = vrot.lane.b32.xlu1 %v3972_v2, %s2599_s24  ;;  %v2394_v4 = vld [vmem:[%s2647_s19 + $0x60] sm:$0xff] }
 0x184   : > { %1173 = vrot.lane.b32.xlu2 %v3973_v7, %s2599_s24 }
 0x185   : > { %v957_v5 = vpop.permute.xlu0 %956  ;;  %v959_v6 = vpop.permute.xlu1 %958 }
 0x186   : > { %1053 = vst.msk [vmem:[#allocation2] sm:$0xff] %vm1052_vm4, %v957_v5  ;;  %v979_v8 = vpop.permute.xlu2 %978 }
 0x187   : > { %1054 = vst.msk [vmem:[#allocation2 + $0x8] sm:$0xff] %vm1052_vm4, %v959_v6 }
 0x188   : > { %1064 = vst.msk [vmem:[#allocation2 + $0x58] sm:$0xff] %vm1052_vm4, %v979_v8 }
 0x18b   : > { %1175 = vrot.lane.b32.xlu0 %v3974_v9, %s2599_s24  ;;  %1177 = vrot.lane.b32.xlu1 %v3975_v10, %s2599_s24 }
 0x18c   : > { %1179 = vrot.lane.b32.xlu2 %v3976_v13, %s2599_s24 }
 0x18d   : > { %v963_v11 = vpop.permute.xlu0 %962  ;;  %v965_v12 = vpop.permute.xlu1 %964 }
 0x18e   : > { %1056 = vst.msk [vmem:[#allocation2 + $0x18] sm:$0xff] %vm1052_vm4, %v963_v11  ;;  %v985_v14 = vpop.permute.xlu2 %984 }
 0x18f   : > { %1057 = vst.msk [vmem:[#allocation2 + $0x20] sm:$0xff] %vm1052_vm4, %v965_v12 }
 0x190   : > { %1067 = vst.msk [vmem:[#allocation2 + $0x70] sm:$0xff] %vm1052_vm4, %v985_v14  ;;  %v2438_v14 = vld [vmem:[%s2647_s19 + $0xf1] sm:$0xff] }
 0x193   : > { %1181 = vrot.lane.b32.xlu0 %v3977_v15, %s2599_s24  ;;  %1183 = vrot.lane.b32.xlu1 %v3978_v16, %s2599_s24 }
 0x194   : > { %1185 = vrot.lane.b32.xlu2 %v3979_v19, %s2599_s24 }
 0x195   : > { %v969_v17 = vpop.permute.xlu0 %968  ;;  %v971_v18 = vpop.permute.xlu1 %970 }
 0x196   : > { %1059 = vst.msk [vmem:[#allocation2 + $0x30] sm:$0xff] %vm1052_vm4, %v969_v17  ;;  %v991_v20 = vpop.permute.xlu2 %990  ;;  %v2470_v17 = vld [vmem:[%s2647_s19 + $0xf2] sm:$0xff] }
 0x197   : > { %1060 = vst.msk [vmem:[#allocation2 + $0x38] sm:$0xff] %vm1052_vm4, %v971_v18  ;;  %v2478_v18 = vld [vmem:[%s2647_s19 + $0x152] sm:$0xff] }
 0x198   : > { %1070 = vst.msk [vmem:[#allocation2 + $0x88] sm:$0xff] %vm1052_vm4, %v991_v20 }
 0x19b   : > { %1187 = vrot.lane.b32.xlu0 %v3980_v21, %s2599_s24  ;;  %1189 = vrot.lane.b32.xlu1 %v3981_v22, %s2599_s24  ;;  %v2430_v22 = vld [vmem:[%s2647_s19 + $0x91] sm:$0xff] }
 0x19c   : > { %1191 = vrot.lane.b32.xlu2 %v3982_v25, %s2599_s24 }
 0x19d   : > { %v975_v23 = vpop.permute.xlu0 %974  ;;  %v977_v24 = vpop.permute.xlu1 %976 }
 0x19e   : > { %1062 = vst.msk [vmem:[#allocation2 + $0x48] sm:$0xff] %vm1052_vm4, %v975_v23  ;;  %v997_v26 = vpop.permute.xlu2 %996  ;;  %v2407_v23 = vld [vmem:[%s2647_s19 + $0xf8] sm:$0xff] }
 0x19f   : > { %1063 = vst.msk [vmem:[#allocation2 + $0x50] sm:$0xff] %vm1052_vm4, %v977_v24 }
 0x1a0   : > { %1073 = vst.msk [vmem:[#allocation2 + $0xa0] sm:$0xff] %vm1052_vm4, %v997_v26 }
 0x1a3   : > { %1193 = vrot.lane.b32.xlu0 %v3983_v27, %s2599_s24  ;;  %1195 = vrot.lane.b32.xlu1 %v3984_v38, %s2599_s24  ;;  %v2454_v27 = vld [vmem:[%s2647_s19 + $0x32] sm:$0xff] }
 0x1a4   : > { %1197 = vrot.lane.b32.xlu2 %v3985_v31, %s2599_s24  ;;  %v2462_v38 = vld [vmem:[%s2647_s19 + $0x92] sm:$0xff] }
 0x1a5   : > { %v981_v29 = vpop.permute.xlu0 %980  ;;  %v983_v30 = vpop.permute.xlu1 %982 }
 0x1a6   : > { %1065 = vst.msk [vmem:[#allocation2 + $0x60] sm:$0xff] %vm1052_vm4, %v981_v29  ;;  %v1003_v42 = vpop.permute.xlu2 %1002 }
 0x1a7   : > { %1066 = vst.msk [vmem:[#allocation2 + $0x68] sm:$0xff] %vm1052_vm4, %v983_v30  ;;  %v2439_v30 = vld [vmem:[%s2647_s19 + $0xf9] sm:$0xff] }
 0x1a8   : > { %1076 = vst.msk [vmem:[#allocation2 + $0xb8] sm:$0xff] %vm1052_vm4, %v1003_v42 }
 0x1ab   : > { %1199 = vrot.lane.b32.xlu0 %v3986_v45, %s2599_s24  ;;  %1201 = vrot.lane.b32.xlu1 %v3987_v60, %s2599_s24  ;;  %v2471_v45 = vld [vmem:[%s2647_s19 + $0xfa] sm:$0xff] }
 0x1ac   : > { %1203 = vrot.lane.b32.xlu2 %v3988_v3, %s2599_s24 }
 0x1ad   : > { %v987_v61 = vpop.permute.xlu0 %986  ;;  %v989_v55 = vpop.permute.xlu1 %988 }
 0x1ae   : > { %1068 = vst.msk [vmem:[#allocation2 + $0x78] sm:$0xff] %vm1052_vm4, %v987_v61  ;;  %v1009_v63 = vpop.permute.xlu2 %1008  ;;  %v2479_v61 = vld [vmem:[%s2647_s19 + $0x15a] sm:$0xff] }
 0x1af   : > { %1069 = vst.msk [vmem:[#allocation2 + $0x80] sm:$0xff] %vm1052_vm4, %v989_v55 }
 0x1b0   : > { %1079 = vst.msk [vmem:[#allocation2 + $0xd0] sm:$0xff] %vm1052_vm4, %v1009_v63  ;;  %v2423_v63 = vld [vmem:[%s2647_s19 + $0x39] sm:$0xff] }
 0x1b3   : > { %1205 = vrot.lane.b32.xlu0 %v3989_v48, %s2599_s24  ;;  %1207 = vrot.lane.b32.xlu1 %v3990_v57, %s2599_s24  ;;  %v2431_v48 = vld [vmem:[%s2647_s19 + $0x99] sm:$0xff] }
 0x1b4   : > { %1209 = vrot.lane.b32.xlu2 %v3426_v54, %s2599_s24 }
 0x1b5   : > { %v993_v41 = vpop.permute.xlu0 %992  ;;  %v995_v52 = vpop.permute.xlu1 %994 }
 0x1b6   : > { %1071 = vst.msk [vmem:[#allocation2 + $0x90] sm:$0xff] %vm1052_vm4, %v993_v41  ;;  %v1015_v37 = vpop.permute.xlu2 %1014  ;;  %v2408_v41 = vld [vmem:[%s2647_s19 + $0x108] sm:$0xff] }
 0x1b7   : > { %1072 = vst.msk [vmem:[#allocation2 + $0x98] sm:$0xff] %vm1052_vm4, %v995_v52 }
 0x1b8   : > { %1082 = vst.msk [vmem:[#allocation2 + $0xe8] sm:$0xff] %vm1052_vm4, %v1015_v37  ;;  %v2455_v37 = vld [vmem:[%s2647_s19 + $0x3a] sm:$0xff] }
 0x1bb   : > { %1211 = vrot.lane.b32.xlu0 %v3433_v56, %s2599_s24  ;;  %1345 = vrot.lane.b32.xlu1 %v2390_v59, %s2600_s25 }
 0x1bc   : > { %1347 = vrot.lane.b32.xlu2 %v2391_v43, %s2600_s25 }
 0x1bd   : > { %v999_v44 = vpop.permute.xlu0 %998  ;;  %v1001_v34 = vpop.permute.xlu1 %1000 }
 0x1be   : > { %1074 = vst.msk [vmem:[#allocation2 + $0xa8] sm:$0xff] %vm1052_vm4, %v999_v44  ;;  %v1150_v1 = vpop.permute.xlu2 %1149  ;;  %v2463_v44 = vld [vmem:[%s2647_s19 + $0x9a] sm:$0xff] }
 0x1bf   : > { %1075 = vst.msk [vmem:[#allocation2 + $0xb0] sm:$0xff] %vm1052_vm4, %v1001_v34 }
 0x1c0   : > { %1246 = vst.msk [vmem:[#allocation2] sm:$0xff] %vm1245_vm5, %v1150_v1 }
 0x1c3   : > { %1349 = vrot.lane.b32.xlu0 %v2854_v46, %s2600_s25  ;;  %1351 = vrot.lane.b32.xlu1 %v2877_v51, %s2600_s25  ;;  %v2397_v46 = vld [vmem:[%s2647_s19 + $0x80] sm:$0xff] }
 0x1c4   : > { %1353 = vrot.lane.b32.xlu2 %v2394_v4, %s2600_s25  ;;  %v2440_v4 = vld [vmem:[%s2647_s19 + $0x109] sm:$0xff] }
 0x1c5   : > { %v1005_v2 = vpop.permute.xlu0 %1004  ;;  %v1007_v5 = vpop.permute.xlu1 %1006 }
 0x1c6   : > { %1077 = vst.msk [vmem:[#allocation2 + $0xc0] sm:$0xff] %vm1052_vm4, %v1005_v2  ;;  %v1156_v6 = vpop.permute.xlu2 %1155  ;;  %v2448_v2 = vld [vmem:[%s2647_s19 + $0x169] sm:$0xff] }
 0x1c7   : > { %1078 = vst.msk [vmem:[#allocation2 + $0xc8] sm:$0xff] %vm1052_vm4, %v1007_v5 }
 0x1c8   : > { %1249 = vst.msk [vmem:[#allocation2 + $0x18] sm:$0xff] %vm1245_vm5, %v1156_v6 }
 0x1cb   : > { %1355 = vrot.lane.b32.xlu0 %v2885_v53, %s2600_s25  ;;  %1357 = vrot.lane.b32.xlu1 %v2908_v58, %s2600_s25  ;;  %v2400_v53 = vld [vmem:[%s2647_s19 + $0xa8] sm:$0xff] }
 0x1cc   : > { %1359 = vrot.lane.b32.xlu2 %v2397_v46, %s2600_s25 }
 0x1cd   : > { %v1011_v51 = vpop.permute.xlu0 %1010  ;;  %v1013_v7 = vpop.permute.xlu1 %1012 }
 0x1ce   : > { %1080 = vst.msk [vmem:[#allocation2 + $0xd8] sm:$0xff] %vm1052_vm4, %v1011_v51  ;;  %v1162_v8 = vpop.permute.xlu2 %1161  ;;  %v2480_v51 = vld [vmem:[%s2647_s19 + $0x16a] sm:$0xff] }
 0x1cf   : > { %1081 = vst.msk [vmem:[#allocation2 + $0xe0] sm:$0xff] %vm1052_vm4, %v1013_v7  ;;  %v2424_v7 = vld [vmem:[%s2647_s19 + $0x49] sm:$0xff] }
 0x1d0   : > { %1252 = vst.msk [vmem:[#allocation2 + $0x30] sm:$0xff] %vm1245_vm5, %v1162_v8 }
 0x1d3   : > { %1361 = vrot.lane.b32.xlu0 %v2918_v62, %s2600_s25  ;;  %1363 = vrot.lane.b32.xlu1 %v2941_v33, %s2600_s25  ;;  %v2403_v62 = vld [vmem:[%s2647_s19 + $0xc8] sm:$0xff] }
 0x1d4   : > { %1365 = vrot.lane.b32.xlu2 %v2400_v53, %s2600_s25  ;;  %v2432_v53 = vld [vmem:[%s2647_s19 + $0xa9] sm:$0xff] }
 0x1d5   : > { %v1017_v58 = vpop.permute.xlu0 %1016  ;;  %v1019_v9 = vpop.permute.xlu1 %1018 }
 0x1d6   : > { %1083 = vst.msk [vmem:[#allocation2 + $0xf0] sm:$0xff] %vm1052_vm4, %v1017_v58  ;;  %v1168_v10 = vpop.permute.xlu2 %1167 }
 0x1d7   : > { %1084 = vst.msk [vmem:[#allocation2 + $0xf8] sm:$0xff] %vm1052_vm4, %v1019_v9 }
 0x1d8   : > { %1255 = vst.msk [vmem:[#allocation2 + $0x48] sm:$0xff] %vm1245_vm5, %v1168_v10  ;;  %v2409_v10 = vld [vmem:[%s2647_s19 + $0x110] sm:$0xff] }
 0x1db   : > { %1367 = vrot.lane.b32.xlu0 %v2951_v49, %s2600_s25  ;;  %1369 = vrot.lane.b32.xlu1 %v2974_v39, %s2600_s25  ;;  %v2406_v49 = vld [vmem:[%s2647_s19 + $0xf0] sm:$0xff] }
 0x1dc   : > { %1371 = vrot.lane.b32.xlu2 %v2403_v62, %s2600_s25  ;;  %v2417_v62 = vld [vmem:[%s2647_s19 + $0x170] sm:$0xff] }
 0x1dd   : > { %v1152_v33 = vpop.permute.xlu0 %1151  ;;  %v1154_v11 = vpop.permute.xlu1 %1153 }
 0x1de   : > { %1247 = vst.msk [vmem:[#allocation2 + $0x8] sm:$0xff] %vm1245_vm5, %v1152_v33  ;;  %v1174_v12 = vpop.permute.xlu2 %1173 }
 0x1df   : > { %1248 = vst.msk [vmem:[#allocation2 + $0x10] sm:$0xff] %vm1245_vm5, %v1154_v11  ;;  %v2456_v11 = vld [vmem:[%s2647_s19 + $0x4a] sm:$0xff] }
 0x1e0   : > { %1258 = vst.msk [vmem:[#allocation2 + $0x60] sm:$0xff] %vm1245_vm5, %v1174_v12 }
 0x1e3   : > { %1373 = vrot.lane.b32.xlu0 %v2984_v0, %s2600_s25  ;;  %1375 = vrot.lane.b32.xlu1 %v3007_v32, %s2600_s25  ;;  %v2446_v0 = vld [vmem:[%s2647_s19 + $0x151] sm:$0xff] }
 0x1e4   : > { %1377 = vrot.lane.b32.xlu2 %v2406_v49, %s2600_s25 }
 0x1e5   : > { %v1158_v39 = vpop.permute.xlu0 %1157  ;;  %v1160_v13 = vpop.permute.xlu1 %1159 }
 0x1e6   : > { %1250 = vst.msk [vmem:[#allocation2 + $0x20] sm:$0xff] %vm1245_vm5, %v1158_v39  ;;  %v1180_v15 = vpop.permute.xlu2 %1179  ;;  %v2464_v39 = vld [vmem:[%s2647_s19 + $0xaa] sm:$0xff] }
 0x1e7   : > { %1251 = vst.msk [vmem:[#allocation2 + $0x28] sm:$0xff] %vm1245_vm5, %v1160_v13  ;;  %v2441_v13 = vld [vmem:[%s2647_s19 + $0x111] sm:$0xff] }
 0x1e8   : > { %1261 = vst.msk [vmem:[#allocation2 + $0x78] sm:$0xff] %vm1245_vm5, %v1180_v15  ;;  %v2449_v15 = vld [vmem:[%s2647_s19 + $0x171] sm:$0xff] }
 0x1eb   : > { %1393 = vrot.lane.b32.xlu0 %v3106_v50, %s2600_s25  ;;  %1570 = vrot.lane.b32.xlu1 %v2438_v14, %s2601_s26  ;;  %v2422_v50 = vld [vmem:[%s2647_s19 + $0x31] sm:$0xff] }
 0x1ec   : > { %1586 = vrot.lane.b32.xlu2 %v2446_v0, %s2601_s26 }
 0x1ed   : > { %v1164_v32 = vpop.permute.xlu0 %1163  ;;  %v1166_v16 = vpop.permute.xlu1 %1165 }
 0x1ee   : > { %1253 = vst.msk [vmem:[#allocation2 + $0x38] sm:$0xff] %vm1245_vm5, %v1164_v32  ;;  %v1186_v19 = vpop.permute.xlu2 %1185 }
 0x1ef   : > { %1254 = vst.msk [vmem:[#allocation2 + $0x40] sm:$0xff] %vm1245_vm5, %v1166_v16  ;;  %v2473_v16 = vld [vmem:[%s2647_s19 + $0x112] sm:$0xff] }
 0x1f0   : > { %1264 = vst.msk [vmem:[#allocation2 + $0x90] sm:$0xff] %vm1245_vm5, %v1186_v19  ;;  %v2425_v19 = vld [vmem:[%s2647_s19 + $0x51] sm:$0xff] }
 0x1f3   : > { %1763 = vrot.lane.b32.xlu0 %v2470_v17, %s2602_s27  ;;  %1779 = vrot.lane.b32.xlu1 %v2478_v18, %s2602_s27  ;;  %v2481_v17 = vld [vmem:[%s2647_s19 + $0x172] sm:$0xff] }
 0x1f4   : > { %1538 = vrot.lane.b32.xlu2 %v2422_v50, %s2601_s26  ;;  %v1896_v50 = vld [vmem:[%s3898_s1 + $0x20] sm:$0xf] }
 0x1f5   : > { %v1170_v20 = vpop.permute.xlu0 %1169  ;;  %v1172_v21 = vpop.permute.xlu1 %1171  ;;  %2523 = vmatpush.msk.msra.mxu2 %vm1998_vm7, %v1896_v50  ;;  %2524 = vmatpush.msk.msra.mxu3 %vm1998_vm7, %v1896_v50 }
 0x1f6   : > { %1256 = vst.msk [vmem:[#allocation2 + $0x50] sm:$0xff] %vm1245_vm5, %v1170_v20  ;;  %v1192_v24 = vpop.permute.xlu2 %1191  ;;  %2486 = vmatpush.msk.msra.mxu0 %vm1998_vm7, %v1896_v50  ;;  %2522 = vmatpush.msk.msra.mxu1 %vm1998_vm7, %v1896_v50  ;;  %v2484_v50 = vld [vmem:[%s2647_s19 + $0x19a] sm:$0xff] }
 0x1f7   : > { %1257 = vst.msk [vmem:[#allocation2 + $0x58] sm:$0xff] %vm1245_vm5, %v1172_v21 }
 0x1f8   : > { %1267 = vst.msk [vmem:[#allocation2 + $0xa8] sm:$0xff] %vm1245_vm5, %v1192_v24  ;;  %v2433_v24 = vld [vmem:[%s2647_s19 + $0xb1] sm:$0xff] }
 0x1fb   : > { %1554 = vrot.lane.b32.xlu0 %v2430_v22, %s2601_s26  ;;  %1379 = vrot.lane.b32.xlu1 %v2407_v23, %s2600_s25  ;;  %v1895_v22 = vld [vmem:[%s3898_s1 + $0x18] sm:$0xff]  ;;  %v1894_v23 = vld [vmem:[%s3898_s1 + $0x10] sm:$0xff] }
 0x1fc   : > { %1395 = vrot.lane.b32.xlu2 %v3109_v47, %s2600_s25  ;;  %v2447_v47 = vld [vmem:[%s2647_s19 + $0x159] sm:$0xff]  ;;  %2526 = vmatpush.msra.mxu2 %v1895_v22 }
 0x1fd   : > { %v1176_v25 = vpop.permute.xlu0 %1175  ;;  %v1178_v26 = vpop.permute.xlu1 %1177  ;;  %2527 = vmatpush.msra.mxu3 %v1895_v22  ;;  %2014 = vmatpush.msra.mxu0 %v1895_v22 }
 0x1fe   : > { %1259 = vst.msk [vmem:[#allocation2 + $0x68] sm:$0xff] %vm1245_vm5, %v1176_v25  ;;  %v1198_v29 = vpop.permute.xlu2 %1197  ;;  %v2410_v25 = vld [vmem:[%s2647_s19 + $0x120] sm:$0xff]  ;;  %2525 = vmatpush.msra.mxu1 %v1895_v22  ;;  %2529 = vmatpush.msra.mxu2 %v1894_v23 }
 0x1ff   : > { %1260 = vst.msk [vmem:[#allocation2 + $0x70] sm:$0xff] %vm1245_vm5, %v1178_v26  ;;  %2530 = vmatpush.msra.mxu3 %v1894_v23  ;;  %2015 = vmatpush.msra.mxu0 %v1894_v23 }
 0x200   : > { %1270 = vst.msk [vmem:[#allocation2 + $0xc0] sm:$0xff] %vm1245_vm5, %v1198_v29  ;;  %2528 = vmatpush.msra.mxu1 %v1894_v23  ;;  %v1892_v29 = vld [vmem:[%s3898_s1] sm:$0xff] }
 0x203   : > { %1731 = vrot.lane.b32.xlu0 %v2454_v27, %s2602_s27  ;;  %1747 = vrot.lane.b32.xlu1 %v2462_v38, %s2602_s27  ;;  %v1893_v27 = vld [vmem:[%s3898_s1 + $0x8] sm:$0xff]  ;;  %v2418_v38 = vld [vmem:[%s2647_s19 + $0x180] sm:$0xff] }
 0x204   : > { %1572 = vrot.lane.b32.xlu2 %v2439_v30, %s2601_s26  ;;  %2532 = vmatpush.msra.mxu2 %v1893_v27 }
 0x205   : > { %v1182_v31 = vpop.permute.xlu0 %1181  ;;  %v1184_v42 = vpop.permute.xlu1 %1183  ;;  %2533 = vmatpush.msra.mxu3 %v1893_v27  ;;  %2016 = vmatpush.msra.mxu0 %v1893_v27 }
 0x206   : > { %1262 = vst.msk [vmem:[#allocation2 + $0x80] sm:$0xff] %vm1245_vm5, %v1182_v31  ;;  %v1204_v60 = vpop.permute.xlu2 %1203  ;;  %2531 = vmatpush.msra.mxu1 %v1893_v27  ;;  %2535 = vmatpush.msra.mxu2 %v1892_v29 }
 0x207   : > { %1263 = vst.msk [vmem:[#allocation2 + $0x88] sm:$0xff] %vm1245_vm5, %v1184_v42  ;;  %2536 = vmatpush.msra.mxu3 %v1892_v29  ;;  %2017 = vmatpush.msra.mxu0 %v1892_v29  ;;  %v2457_v42 = vld [vmem:[%s2647_s19 + $0x52] sm:$0xff] }
 0x208   : > { %1273 = vst.msk [vmem:[#allocation2 + $0xd8] sm:$0xff] %vm1245_vm5, %v1204_v60  ;;  %2534 = vmatpush.msra.mxu1 %v1892_v29  ;;  %v2442_v60 = vld [vmem:[%s2647_s19 + $0x121] sm:$0xff] }
 0x20b   : > { %1588 = vrot.lane.b32.xlu0 %v2447_v47, %s2601_s26  ;;  %1765 = vrot.lane.b32.xlu1 %v2471_v45, %s2602_s27  ;;  %v2465_v47 = vld [vmem:[%s2647_s19 + $0xb2] sm:$0xff] }
 0x20c   : > { %1781 = vrot.lane.b32.xlu2 %v2479_v61, %s2602_s27 }
 0x20d   : > { %v1188_v55 = vpop.permute.xlu0 %1187  ;;  %v1190_v3 = vpop.permute.xlu1 %1189 }
 0x20e   : > { %1265 = vst.msk [vmem:[#allocation2 + $0x98] sm:$0xff] %vm1245_vm5, %v1188_v55  ;;  %v1210_v57 = vpop.permute.xlu2 %1209 }
 0x20f   : > { %1266 = vst.msk [vmem:[#allocation2 + $0xa0] sm:$0xff] %vm1245_vm5, %v1190_v3  ;;  %v2474_v3 = vld [vmem:[%s2647_s19 + $0x122] sm:$0xff] }
 0x210   : > { %1276 = vst.msk [vmem:[#allocation2 + $0xf0] sm:$0xff] %vm1245_vm5, %v1210_v57 }
 0x213   : > { %1540 = vrot.lane.b32.xlu0 %v2423_v63, %s2601_s26  ;;  %1556 = vrot.lane.b32.xlu1 %v2431_v48, %s2601_s26 }
 0x214   : > { %1381 = vrot.lane.b32.xlu2 %v2408_v41, %s2600_s25  ;;  %v2426_v41 = vld [vmem:[%s2647_s19 + $0x61] sm:$0xff] }
 0x215   : > { %v1194_v52 = vpop.permute.xlu0 %1193  ;;  %v1196_v59 = vpop.permute.xlu1 %1195 }
 0x216   : > { %1268 = vst.msk [vmem:[#allocation2 + $0xb0] sm:$0xff] %vm1245_vm5, %v1194_v52  ;;  %v1348_v43 = vpop.permute.xlu2 %1347  ;;  %v2434_v52 = vld [vmem:[%s2647_s19 + $0xc1] sm:$0xff] }
 0x217   : > { %1269 = vst.msk [vmem:[#allocation2 + $0xb8] sm:$0xff] %vm1245_vm5, %v1196_v59 }
 0x218   : > { %1443 = vst.msk [vmem:[#allocation2 + $0x8] sm:$0xff] %vm1441_vm6, %v1348_v43 }
 0x21b   : > { %1397 = vrot.lane.b32.xlu0 %v3116_v40, %s2600_s25  ;;  %1733 = vrot.lane.b32.xlu1 %v2455_v37, %s2602_s27  ;;  %v2472_v40 = vld [vmem:[%s2647_s19 + $0x10a] sm:$0xff] }
 0x21c   : > { %1749 = vrot.lane.b32.xlu2 %v2463_v44, %s2602_s27 }
 0x21d   : > { %v1200_v34 = vpop.permute.xlu0 %1199  ;;  %v1202_v1 = vpop.permute.xlu1 %1201 }
 0x21e   : > { %1271 = vst.msk [vmem:[#allocation2 + $0xc8] sm:$0xff] %vm1245_vm5, %v1200_v34  ;;  %v1354_v5 = vpop.permute.xlu2 %1353  ;;  %v2466_v34 = vld [vmem:[%s2647_s19 + $0xc2] sm:$0xff] }
 0x21f   : > { %1272 = vst.msk [vmem:[#allocation2 + $0xd0] sm:$0xff] %vm1245_vm5, %v1202_v1 }
 0x220   : > { %1446 = vst.msk [vmem:[#allocation2 + $0x20] sm:$0xff] %vm1441_vm6, %v1354_v5 }
 0x223   : > { %1574 = vrot.lane.b32.xlu0 %v2440_v4, %s2601_s26  ;;  %1590 = vrot.lane.b32.xlu1 %v2448_v2, %s2601_s26 }
 0x224   : > { %1767 = vrot.lane.b32.xlu2 %v2472_v40, %s2602_s27 }
 0x225   : > { %v1206_v6 = vpop.permute.xlu0 %1205  ;;  %v1208_v46 = vpop.permute.xlu1 %1207 }
 0x226   : > { %1274 = vst.msk [vmem:[#allocation2 + $0xe0] sm:$0xff] %vm1245_vm5, %v1206_v6  ;;  %v1360_v8 = vpop.permute.xlu2 %1359  ;;  %v2475_v6 = vld [vmem:[%s2647_s19 + $0x12a] sm:$0xff] }
 0x227   : > { %1275 = vst.msk [vmem:[#allocation2 + $0xe8] sm:$0xff] %vm1245_vm5, %v1208_v46 }
 0x228   : > { %1449 = vst.msk [vmem:[#allocation2 + $0x38] sm:$0xff] %vm1441_vm6, %v1360_v8 }
 0x22b   : > { %1783 = vrot.lane.b32.xlu0 %v2480_v51, %s2602_s27  ;;  %1542 = vrot.lane.b32.xlu1 %v2424_v7, %s2601_s26  ;;  %v2427_v7 = vld [vmem:[%s2647_s19 + $0x69] sm:$0xff] }
 0x22c   : > { %1558 = vrot.lane.b32.xlu2 %v2432_v53, %s2601_s26  ;;  %v2435_v53 = vld [vmem:[%s2647_s19 + $0xc9] sm:$0xff] }
 0x22d   : > { %v1212_v58 = vpop.permute.xlu0 %1211  ;;  %v1346_v9 = vpop.permute.xlu1 %1345 }
 0x22e   : > { %1277 = vst.msk [vmem:[#allocation2 + $0xf8] sm:$0xff] %vm1245_vm5, %v1212_v58  ;;  %v1366_v33 = vpop.permute.xlu2 %1365 }
 0x22f   : > { %1442 = vst.msk [vmem:[#allocation2] sm:$0xff] %vm1441_vm6, %v1346_v9 }
 0x230   : > { %1452 = vst.msk [vmem:[#allocation2 + $0x50] sm:$0xff] %vm1441_vm6, %v1366_v33 }
 0x233   : > { %1383 = vrot.lane.b32.xlu0 %v2409_v10, %s2600_s25  ;;  %1399 = vrot.lane.b32.xlu1 %v2417_v62, %s2600_s25  ;;  %v2420_v62 = vld [vmem:[%s2647_s19 + $0x198] sm:$0xff] }
 0x234   : > { %1735 = vrot.lane.b32.xlu2 %v2456_v11, %s2602_s27  ;;  %v2459_v11 = vld [vmem:[%s2647_s19 + $0x6a] sm:$0xff] }
 0x235   : > { %v1350_v12 = vpop.permute.xlu0 %1349  ;;  %v1352_v49 = vpop.permute.xlu1 %1351 }
 0x236   : > { %1444 = vst.msk [vmem:[#allocation2 + $0x10] sm:$0xff] %vm1441_vm6, %v1350_v12  ;;  %v1372_v14 = vpop.permute.xlu2 %1371 }
 0x237   : > { %1445 = vst.msk [vmem:[#allocation2 + $0x18] sm:$0xff] %vm1441_vm6, %v1352_v49 }
 0x238   : > { %1455 = vst.msk [vmem:[#allocation2 + $0x68] sm:$0xff] %vm1441_vm6, %v1372_v14  ;;  %v2467_v14 = vld [vmem:[%s2647_s19 + $0xca] sm:$0xff] }
 0x23b   : > { %1751 = vrot.lane.b32.xlu0 %v2464_v39, %s2602_s27  ;;  %1576 = vrot.lane.b32.xlu1 %v2441_v13, %s2601_s26 }
 0x23c   : > { %1592 = vrot.lane.b32.xlu2 %v2449_v15, %s2601_s26  ;;  %v2444_v15 = vld [vmem:[%s2647_s19 + $0x139] sm:$0xff] }
 0x23d   : > { %v1356_v0 = vpop.permute.xlu0 %1355  ;;  %v1358_v32 = vpop.permute.xlu1 %1357 }
 0x23e   : > { %1447 = vst.msk [vmem:[#allocation2 + $0x28] sm:$0xff] %vm1441_vm6, %v1356_v0  ;;  %v1378_v18 = vpop.permute.xlu2 %1377 }
 0x23f   : > { %1448 = vst.msk [vmem:[#allocation2 + $0x30] sm:$0xff] %vm1441_vm6, %v1358_v32  ;;  %v2452_v32 = vld [vmem:[%s2647_s19 + $0x199] sm:$0xff] }
 0x240   : > { %1458 = vst.msk [vmem:[#allocation2 + $0x80] sm:$0xff] %vm1441_vm6, %v1378_v18 }
 0x243   : > { %1769 = vrot.lane.b32.xlu0 %v2473_v16, %s2602_s27  ;;  %1785 = vrot.lane.b32.xlu1 %v2481_v17, %s2602_s27 }
 0x244   : > { %1544 = vrot.lane.b32.xlu2 %v2425_v19, %s2601_s26  ;;  %v2476_v19 = vld [vmem:[%s2647_s19 + $0x13a] sm:$0xff] }
 0x245   : > { %v1362_v20 = vpop.permute.xlu0 %1361  ;;  %v1364_v21 = vpop.permute.xlu1 %1363 }
 0x246   : > { %1450 = vst.msk [vmem:[#allocation2 + $0x40] sm:$0xff] %vm1441_vm6, %v1362_v20  ;;  %v1587_v26 = vpop.permute.xlu2 %1586 }
 0x247   : > { %1451 = vst.msk [vmem:[#allocation2 + $0x48] sm:$0xff] %vm1441_vm6, %v1364_v21  ;;  %v2428_v21 = vld [vmem:[%s2647_s19 + $0x79] sm:$0xff] }
 0x24b   : > { %1560 = vrot.lane.b32.xlu0 %v2433_v24, %s2601_s26  ;;  %1385 = vrot.lane.b32.xlu1 %v2410_v25, %s2600_s25  ;;  %v2436_v25 = vld [vmem:[%s2647_s19 + $0xd9] sm:$0xff] }
 0x24c   : > { %1401 = vrot.lane.b32.xlu2 %v2418_v38, %s2600_s25  ;;  %v2421_v38 = vld [vmem:[%s2647_s19 + $0x1a0] sm:$0xff] }
 0x24d   : > { %v1368_v30 = vpop.permute.xlu0 %1367  ;;  %v1370_v31 = vpop.permute.xlu1 %1369 }
 0x24e   : > { %1453 = vst.msk [vmem:[#allocation2 + $0x58] sm:$0xff] %vm1441_vm6, %v1368_v30  ;;  %v1539_v45 = vpop.permute.xlu2 %1538 }
 0x24f   : > { %1454 = vst.msk [vmem:[#allocation2 + $0x60] sm:$0xff] %vm1441_vm6, %v1370_v31 }
 0x250   : > { %1635 = vst.msk [vmem:[#allocation2] sm:$0xff] %vm1634_vm8, %v1539_v45 }
 0x253   : > { %1737 = vrot.lane.b32.xlu0 %v2457_v42, %s2602_s27  ;;  %1753 = vrot.lane.b32.xlu1 %v2465_v47, %s2602_s27  ;;  %v2460_v42 = vld [vmem:[%s2647_s19 + $0x7a] sm:$0xff] }
 0x254   : > { %1578 = vrot.lane.b32.xlu2 %v2442_v60, %s2601_s26  ;;  %v2468_v47 = vld [vmem:[%s2647_s19 + $0xda] sm:$0xff] }
 0x255   : > { %v1374_v61 = vpop.permute.xlu0 %1373  ;;  %v1376_v55 = vpop.permute.xlu1 %1375  ;;  %v2445_v60 = vld [vmem:[%s2647_s19 + $0x141] sm:$0xff] }
 0x256   : > { %1456 = vst.msk [vmem:[#allocation2 + $0x70] sm:$0xff] %vm1441_vm6, %v1374_v61  ;;  %v1396_v63 = vpop.permute.xlu2 %1395 }
 0x257   : > { %1457 = vst.msk [vmem:[#allocation2 + $0x78] sm:$0xff] %vm1441_vm6, %v1376_v55 }
 0x258   : > { %1467 = vst.msk [vmem:[#allocation2 + $0xc8] sm:$0xff] %vm1441_vm6, %v1396_v63 }
 0x25b   : > { %1594 = vrot.lane.b32.xlu0 %v3325_v28, %s2601_s26  ;;  %1771 = vrot.lane.b32.xlu1 %v2474_v3, %s2602_s27  ;;  %v2411_v28 = vld [vmem:[%s2647_s19 + $0x128] sm:$0xff] }
 0x25c   : > { %1787 = vrot.lane.b32.xlu2 %v3426_v54, %s2602_s27  ;;  %v2458_v54 = vld [vmem:[%s2647_s19 + $0x62] sm:$0xff] }
 0x25d   : > { %v1394_v48 = vpop.permute.xlu0 %1393  ;;  %v1571_v57 = vpop.permute.xlu1 %1570 }
 0x25e   : > { %1466 = vst.msk [vmem:[#allocation2 + $0xc0] sm:$0xff] %vm1441_vm6, %v1394_v48  ;;  %v1573_v59 = vpop.permute.xlu2 %1572  ;;  %v2453_v48 = vld [vmem:[%s2647_s19 + $0x1a1] sm:$0xff] }
 0x25f   : > { %1651 = vst.msk [vmem:[#allocation2 + $0x80] sm:$0xff] %vm1634_vm8, %v1571_v57  ;;  %v2477_v57 = vld [vmem:[%s2647_s19 + $0x142] sm:$0xff] }
 0x260   : > { %1659 = vst.msk [vmem:[#allocation2 + $0xc0] sm:$0xff] %vm1634_vm8, %v1587_v26  ;;  %v2413_v26 = vld [vmem:[%s2647_s19 + $0x140] sm:$0xff] }
 0x263   : > { %1546 = vrot.lane.b32.xlu0 %v2426_v41, %s2601_s26  ;;  %1562 = vrot.lane.b32.xlu1 %v2434_v52, %s2601_s26  ;;  %v2485_v52 = vld [vmem:[%s2647_s19 + $0x1a2] sm:$0xff] }
 0x264   : > { %1387 = vrot.lane.b32.xlu2 %v2411_v28, %s2600_s25 }
 0x265   : > { %v1764_v37 = vpop.permute.xlu0 %1763  ;;  %v1780_v43 = vpop.permute.xlu1 %1779 }
 0x266   : > { %1844 = vst.msk [vmem:[#allocation2 + $0x80] sm:$0xff] %vm1827_vm9, %v1764_v37  ;;  %v1782_v44 = vpop.permute.xlu2 %1781  ;;  %v2429_v37 = vld [vmem:[%s2647_s19 + $0x81] sm:$0xff] }
 0x267   : > { %1852 = vst.msk [vmem:[#allocation2 + $0xc0] sm:$0xff] %vm1827_vm9, %v1780_v43  ;;  %v2437_v43 = vld [vmem:[%s2647_s19 + $0xe1] sm:$0xff] }
 0x26b   : > { %1403 = vrot.lane.b32.xlu0 %v3228_v35, %s2600_s25  ;;  %1739 = vrot.lane.b32.xlu1 %v2458_v54, %s2602_s27  ;;  %v2443_v35 = vld [vmem:[%s2647_s19 + $0x129] sm:$0xff] }
 0x26c   : > { %1755 = vrot.lane.b32.xlu2 %v2466_v34, %s2602_s27 }
 0x26d   : > { %v1555_v1 = vpop.permute.xlu0 %1554  ;;  %v1876_v4 = vld [vmem:[#allocation2 + $0x80] sm:$0xff]  ;;  %v1380_v2 = vpop.permute.xlu1 %1379 }
 0x26e   : > { %1643 = vst.msk [vmem:[#allocation2 + $0x40] sm:$0xff] %vm1634_vm8, %v1555_v1  ;;  %2503 = vmatmul.msk.f32.vlgmr.msra.gmra.mxu2 %vm1901_vm10, %v1876_v4  ;;  %v1884_v5 = vld [vmem:[#allocation2 + $0xc0] sm:$0xff]  ;;  %v1382_v40 = vpop.permute.xlu2 %1381 }
 0x26f   : > { %1459 = vst.msk [vmem:[#allocation2 + $0x88] sm:$0xff] %vm1441_vm6, %v1380_v2  ;;  %2511 = vmatmul.msk.f32.vlgmr.msra.gmra.mxu3 %vm1901_vm10, %v1884_v5  ;;  %v2469_v2 = vld [vmem:[%s2647_s19 + $0xe2] sm:$0xff] }
 0x270   : > { %1652 = vst.msk [vmem:[#allocation2 + $0x88] sm:$0xff] %vm1634_vm8, %v1573_v59 }
 0x271   : > { %1460 = vst.msk [vmem:[#allocation2 + $0x90] sm:$0xff] %vm1441_vm6, %v1382_v40 }
 0x273   : > { %1580 = vrot.lane.b32.xlu0 %v2443_v35, %s2601_s26  ;;  %1596 = vrot.lane.b32.xlu1 %v3328_v36, %s2601_s26 }
 0x274   : > { %1773 = vrot.lane.b32.xlu2 %v2475_v6, %s2602_s27 }
 0x275   : > { %v1732_v46 = vpop.permute.xlu0 %1731  ;;  %v1748_v51 = vpop.permute.xlu1 %1747 }
 0x276   : > { %1828 = vst.msk [vmem:[#allocation2] sm:$0xff] %vm1827_vm9, %v1732_v46  ;;  %v1750_v8 = vpop.permute.xlu2 %1749 }
 0x277   : > { %1836 = vst.msk [vmem:[#allocation2 + $0x40] sm:$0xff] %vm1827_vm9, %v1748_v51 }
 0x27b   : > { %1789 = vrot.lane.b32.xlu0 %v3433_v56, %s2602_s27  ;;  %1548 = vrot.lane.b32.xlu1 %v2427_v7, %s2601_s26  ;;  %v2412_v56 = vld [vmem:[%s2647_s19 + $0x138] sm:$0xff] }
 0x27c   : > { %1564 = vrot.lane.b32.xlu2 %v2435_v53, %s2601_s26 }
 0x27d   : > { %v1589_v36 = vpop.permute.xlu0 %1588  ;;  %v1860_v58 = vld [vmem:[#allocation2] sm:$0xff]  ;;  %v1766_v9 = vpop.permute.xlu1 %1765 }
 0x27e   : > { %1660 = vst.msk [vmem:[#allocation2 + $0xc8] sm:$0xff] %vm1634_vm8, %v1589_v36  ;;  %2487 = vmatmul.msk.f32.vlgmr.msra.gmra.mxu0 %vm1901_vm10, %v1860_v58  ;;  %v1868_v10 = vld [vmem:[#allocation2 + $0x40] sm:$0xff]  ;;  %v1768_v33 = vpop.permute.xlu2 %1767 }
 0x27f   : > { %1845 = vst.msk [vmem:[#allocation2 + $0x88] sm:$0xff] %vm1827_vm9, %v1766_v9  ;;  %2495 = vmatmul.msk.f32.vlgmr.msra.gmra.mxu1 %vm1901_vm10, %v1868_v10 }
 0x280   : > { %1853 = vst.msk [vmem:[#allocation2 + $0xc8] sm:$0xff] %vm1827_vm9, %v1782_v44  ;;  %v2461_v44 = vld [vmem:[%s2647_s19 + $0x82] sm:$0xff] }
 0x283   : > { %1389 = vrot.lane.b32.xlu0 %v2412_v56, %s2600_s25  ;;  %1405 = vrot.lane.b32.xlu1 %v2420_v62, %s2600_s25 }
 0x284   : > { %1741 = vrot.lane.b32.xlu2 %v2459_v11, %s2602_s27 }
 0x285   : > { %v1541_v12 = vpop.permute.xlu0 %1540  ;;  %v1557_v49 = vpop.permute.xlu1 %1556 }
 0x286   : > { %1636 = vst.msk [vmem:[#allocation2 + $0x8] sm:$0xff] %vm1634_vm8, %v1541_v12  ;;  %v1877_v39 = vld [vmem:[#allocation2 + $0x88] sm:$0xff]  ;;  %v1559_v0 = vpop.permute.xlu2 %1558 }
 0x287   : > { %1644 = vst.msk [vmem:[#allocation2 + $0x48] sm:$0xff] %vm1634_vm8, %v1557_v49  ;;  %2504 = vmatmul.msk.f32.gmra.mxu2 %vm1901_vm10, %v1877_v39  ;;  %v1885_v13 = vld [vmem:[#allocation2 + $0xc8] sm:$0xff] }
 0x288   : > { %2512 = vmatmul.msk.f32.gmra.mxu3 %vm1901_vm10, %v1885_v13  ;;  %1837 = vst.msk [vmem:[#allocation2 + $0x48] sm:$0xff] %vm1827_vm9, %v1750_v8 }
 0x289   : > { %1645 = vst.msk [vmem:[#allocation2 + $0x50] sm:$0xff] %vm1634_vm8, %v1559_v0 }
 0x28b   : > { %1757 = vrot.lane.b32.xlu0 %v2467_v14, %s2602_s27  ;;  %1582 = vrot.lane.b32.xlu1 %v2444_v15, %s2601_s26 }
 0x28c   : > { %1598 = vrot.lane.b32.xlu2 %v2452_v32, %s2601_s26 }
 0x28d   : > { %v1398_v16 = vpop.permute.xlu0 %1397  ;;  %v1734_v17 = vpop.permute.xlu1 %1733 }
 0x28e   : > { %1468 = vst.msk [vmem:[#allocation2 + $0xd0] sm:$0xff] %vm1441_vm6, %v1398_v16  ;;  %v1736_v20 = vpop.permute.xlu2 %1735 }
 0x28f   : > { %1829 = vst.msk [vmem:[#allocation2 + $0x8] sm:$0xff] %vm1827_vm9, %v1734_v17  ;;  %v1869_v18 = vld [vmem:[#allocation2 + $0x48] sm:$0xff] }
 0x290   : > { %2496 = vmatmul.msk.f32.gmra.mxu1 %vm1901_vm10, %v1869_v18 }
 0x293   : > { %1775 = vrot.lane.b32.xlu0 %v2476_v19, %s2602_s27  ;;  %1791 = vrot.lane.b32.xlu1 %v2484_v50, %s2602_s27  ;;  %v3782_v50 = vld [vmem:[%s3899_s2] ss:$0 sm:$0xff] }
 0x294   : > { %1550 = vrot.lane.b32.xlu2 %v2428_v21, %s2601_s26 }
 0x295   : > { %v1575_v22 = vpop.permute.xlu0 %1574  ;;  %v1591_v23 = vpop.permute.xlu1 %1590 }
 0x296   : > { %1653 = vst.msk [vmem:[#allocation2 + $0x90] sm:$0xff] %vm1634_vm8, %v1575_v22  ;;  %v1861_v24 = vld [vmem:[#allocation2 + $0x8] sm:$0xff]  ;;  %v1593_v27 = vpop.permute.xlu2 %1592 }
 0x297   : > { %1661 = vst.msk [vmem:[#allocation2 + $0xd0] sm:$0xff] %vm1634_vm8, %v1591_v23  ;;  %2488 = vmatmul.msk.f32.gmra.mxu0 %vm1901_vm10, %v1861_v24 }
 0x298   : > { %1846 = vst.msk [vmem:[#allocation2 + $0x90] sm:$0xff] %vm1827_vm9, %v1768_v33 }
 0x29b   : > { %1566 = vrot.lane.b32.xlu0 %v2436_v25, %s2601_s26  ;;  %1391 = vrot.lane.b32.xlu1 %v2413_v26, %s2600_s25 }
 0x29c   : > { %1407 = vrot.lane.b32.xlu2 %v2421_v38, %s2600_s25 }
 0x29d   : > { %v1784_v29 = vpop.permute.xlu0 %1783  ;;  %v1543_v30 = vpop.permute.xlu1 %1542 }
 0x29e   : > { %1854 = vst.msk [vmem:[#allocation2 + $0xd0] sm:$0xff] %vm1827_vm9, %v1784_v29  ;;  %v1545_v45 = vpop.permute.xlu2 %1544 }
 0x29f   : > { %1637 = vst.msk [vmem:[#allocation2 + $0x10] sm:$0xff] %vm1634_vm8, %v1543_v30  ;;  %v1878_v31 = vld [vmem:[#allocation2 + $0x90] sm:$0xff] }
 0x2a0   : > { %2505 = vmatmul.msk.f32.gmra.mxu2 %vm1901_vm10, %v1878_v31  ;;  %1830 = vst.msk [vmem:[#allocation2 + $0x10] sm:$0xff] %vm1827_vm9, %v1736_v20 }
 0x2a1   : > { %1638 = vst.msk [vmem:[#allocation2 + $0x18] sm:$0xff] %vm1634_vm8, %v1545_v45 }
 0x2a3   : > { %1743 = vrot.lane.b32.xlu0 %v2460_v42, %s2602_s27  ;;  %1759 = vrot.lane.b32.xlu1 %v2468_v47, %s2602_s27 }
 0x2a4   : > { %1584 = vrot.lane.b32.xlu2 %v2445_v60, %s2601_s26 }
 0x2a5   : > { %v1384_v61 = vpop.permute.xlu0 %1383  ;;  %v1886_v55 = vld [vmem:[#allocation2 + $0xd0] sm:$0xff]  ;;  %v1400_v3 = vpop.permute.xlu1 %1399 }
 0x2a6   : > { %1461 = vst.msk [vmem:[#allocation2 + $0x98] sm:$0xff] %vm1441_vm6, %v1384_v61  ;;  %2513 = vmatmul.msk.f32.gmra.mxu3 %vm1901_vm10, %v1886_v55  ;;  %v1402_v41 = vpop.permute.xlu2 %1401 }
 0x2a7   : > { %1469 = vst.msk [vmem:[#allocation2 + $0xd8] sm:$0xff] %vm1441_vm6, %v1400_v3  ;;  %v1862_v63 = vld [vmem:[#allocation2 + $0x10] sm:$0xff] }
 0x2a8   : > { %1662 = vst.msk [vmem:[#allocation2 + $0xd8] sm:$0xff] %vm1634_vm8, %v1593_v27  ;;  %2489 = vmatmul.msk.f32.gmra.mxu0 %vm1901_vm10, %v1862_v63 }
 0x2a9   : > { %1470 = vst.msk [vmem:[#allocation2 + $0xe0] sm:$0xff] %vm1441_vm6, %v1402_v41 }
 0x2ab   : > { %1600 = vrot.lane.b32.xlu0 %v2453_v48, %s2601_s26  ;;  %1777 = vrot.lane.b32.xlu1 %v2477_v57, %s2602_s27 }
 0x2ac   : > { %1793 = vrot.lane.b32.xlu2 %v2485_v52, %s2602_s27 }
 0x2ad   : > { %v1752_v59 = vpop.permute.xlu0 %1751  ;;  %v1577_v28 = vpop.permute.xlu1 %1576 }
 0x2ae   : > { %1838 = vst.msk [vmem:[#allocation2 + $0x50] sm:$0xff] %vm1827_vm9, %v1752_v59  ;;  %v1579_v54 = vpop.permute.xlu2 %1578 }
 0x2af   : > { %1654 = vst.msk [vmem:[#allocation2 + $0x98] sm:$0xff] %vm1634_vm8, %v1577_v28 }
 0x2b3   : > { %1552 = vrot.lane.b32.xlu0 %v2429_v37, %s2601_s26  ;;  %1568 = vrot.lane.b32.xlu1 %v2437_v43, %s2601_s26 }
 0x2b4   : > { %1745 = vrot.lane.b32.xlu2 %v2461_v44, %s2602_s27 }
 0x2b5   : > { %v1770_v34 = vpop.permute.xlu0 %1769  ;;  %v1870_v1 = vld [vmem:[#allocation2 + $0x50] sm:$0xff]  ;;  %v1786_v4 = vpop.permute.xlu1 %1785 }
 0x2b6   : > { %1847 = vst.msk [vmem:[#allocation2 + $0x98] sm:$0xff] %vm1827_vm9, %v1770_v34  ;;  %2497 = vmatmul.msk.f32.gmra.mxu1 %vm1901_vm10, %v1870_v1  ;;  %v1788_v5 = vpop.permute.xlu2 %1787 }
 0x2b7   : > { %1855 = vst.msk [vmem:[#allocation2 + $0xd8] sm:$0xff] %vm1827_vm9, %v1786_v4 }
 0x2bb   : > { %1761 = vrot.lane.b32.xlu0 %v2469_v2, %s2602_s27 }
 0x2bd   : > { %v1561_v35 = vpop.permute.xlu0 %1560  ;;  %v1879_v40 = vld [vmem:[#allocation2 + $0x98] sm:$0xff]  ;;  %v1386_v6 = vpop.permute.xlu1 %1385 }
 0x2be   : > { %1646 = vst.msk [vmem:[#allocation2 + $0x58] sm:$0xff] %vm1634_vm8, %v1561_v35  ;;  %2506 = vmatmul.msk.f32.gmra.mxu2 %vm1901_vm10, %v1879_v40  ;;  %v1887_v46 = vld [vmem:[#allocation2 + $0xd8] sm:$0xff]  ;;  %v1388_v51 = vpop.permute.xlu2 %1387 }
 0x2bf   : > { %1462 = vst.msk [vmem:[#allocation2 + $0xa0] sm:$0xff] %vm1441_vm6, %v1386_v6  ;;  %2514 = vmatmul.msk.f32.gmra.mxu3 %vm1901_vm10, %v1887_v46 }
 0x2c0   : > { %1655 = vst.msk [vmem:[#allocation2 + $0xa0] sm:$0xff] %vm1634_vm8, %v1579_v54 }
 0x2c1   : > { %1463 = vst.msk [vmem:[#allocation2 + $0xa8] sm:$0xff] %vm1441_vm6, %v1388_v51 }
 0x2c5   : > { %v1738_v7 = vpop.permute.xlu0 %1737  ;;  %v1754_v8 = vpop.permute.xlu1 %1753 }
 0x2c6   : > { %1831 = vst.msk [vmem:[#allocation2 + $0x18] sm:$0xff] %vm1827_vm9, %v1738_v7  ;;  %v1756_v53 = vpop.permute.xlu2 %1755 }
 0x2c7   : > { %1839 = vst.msk [vmem:[#allocation2 + $0x58] sm:$0xff] %vm1827_vm9, %v1754_v8 }
 0x2cd   : > { %v1595_v36 = vpop.permute.xlu0 %1594  ;;  %v1863_v58 = vld [vmem:[#allocation2 + $0x18] sm:$0xff]  ;;  %v1772_v9 = vpop.permute.xlu1 %1771 }
 0x2ce   : > { %1663 = vst.msk [vmem:[#allocation2 + $0xe0] sm:$0xff] %vm1634_vm8, %v1595_v36  ;;  %2490 = vmatmul.msk.f32.gmra.mxu0 %vm1901_vm10, %v1863_v58  ;;  %v1871_v10 = vld [vmem:[#allocation2 + $0x58] sm:$0xff]  ;;  %v1774_v56 = vpop.permute.xlu2 %1773 }
 0x2cf   : > { %1848 = vst.msk [vmem:[#allocation2 + $0xa0] sm:$0xff] %vm1827_vm9, %v1772_v9  ;;  %2498 = vmatmul.msk.f32.gmra.mxu1 %vm1901_vm10, %v1871_v10 }
 0x2d0   : > { %1856 = vst.msk [vmem:[#allocation2 + $0xe0] sm:$0xff] %vm1827_vm9, %v1788_v5 }
 0x2d5   : > { %v1547_v62 = vpop.permute.xlu0 %1546  ;;  %v1563_v33 = vpop.permute.xlu1 %1562 }
 0x2d6   : > { %1639 = vst.msk [vmem:[#allocation2 + $0x20] sm:$0xff] %vm1634_vm8, %v1547_v62  ;;  %v1880_v11 = vld [vmem:[#allocation2 + $0xa0] sm:$0xff]  ;;  %v1565_v49 = vpop.permute.xlu2 %1564 }
 0x2d7   : > { %1647 = vst.msk [vmem:[#allocation2 + $0x60] sm:$0xff] %vm1634_vm8, %v1563_v33  ;;  %2507 = vmatmul.msk.f32.gmra.mxu2 %vm1901_vm10, %v1880_v11  ;;  %v1888_v12 = vld [vmem:[#allocation2 + $0xe0] sm:$0xff] }
 0x2d8   : > { %2515 = vmatmul.msk.f32.gmra.mxu3 %vm1901_vm10, %v1888_v12  ;;  %1840 = vst.msk [vmem:[#allocation2 + $0x60] sm:$0xff] %vm1827_vm9, %v1756_v53 }
 0x2d9   : > { %1648 = vst.msk [vmem:[#allocation2 + $0x68] sm:$0xff] %vm1634_vm8, %v1565_v49 }
 0x2dd   : > { %v1404_v39 = vpop.permute.xlu0 %1403  ;;  %v1740_v13 = vpop.permute.xlu1 %1739 }
 0x2de   : > { %1471 = vst.msk [vmem:[#allocation2 + $0xe8] sm:$0xff] %vm1441_vm6, %v1404_v39  ;;  %v1742_v15 = vpop.permute.xlu2 %1741 }
 0x2df   : > { %1832 = vst.msk [vmem:[#allocation2 + $0x20] sm:$0xff] %vm1827_vm9, %v1740_v13  ;;  %v1872_v14 = vld [vmem:[#allocation2 + $0x60] sm:$0xff] }
 0x2e0   : > { %2499 = vmatmul.msk.f32.gmra.mxu1 %vm1901_vm10, %v1872_v14 }
 0x2e5   : > { %v1581_v0 = vpop.permute.xlu0 %1580  ;;  %v1597_v32 = vpop.permute.xlu1 %1596 }
 0x2e6   : > { %1656 = vst.msk [vmem:[#allocation2 + $0xa8] sm:$0xff] %vm1634_vm8, %v1581_v0  ;;  %v1864_v16 = vld [vmem:[#allocation2 + $0x20] sm:$0xff]  ;;  %v1599_v17 = vpop.permute.xlu2 %1598 }
 0x2e7   : > { %1664 = vst.msk [vmem:[#allocation2 + $0xe8] sm:$0xff] %vm1634_vm8, %v1597_v32  ;;  %2491 = vmatmul.msk.f32.gmra.mxu0 %vm1901_vm10, %v1864_v16 }
 0x2e8   : > { %1849 = vst.msk [vmem:[#allocation2 + $0xa8] sm:$0xff] %vm1827_vm9, %v1774_v56 }
 0x2ed   : > { %v1790_v18 = vpop.permute.xlu0 %1789  ;;  %v1549_v19 = vpop.permute.xlu1 %1548 }
 0x2ee   : > { %1857 = vst.msk [vmem:[#allocation2 + $0xe8] sm:$0xff] %vm1827_vm9, %v1790_v18  ;;  %v1551_v21 = vpop.permute.xlu2 %1550 }
 0x2ef   : > { %1640 = vst.msk [vmem:[#allocation2 + $0x28] sm:$0xff] %vm1634_vm8, %v1549_v19  ;;  %v1881_v20 = vld [vmem:[#allocation2 + $0xa8] sm:$0xff] }
 0x2f0   : > { %2508 = vmatmul.msk.f32.gmra.mxu2 %vm1901_vm10, %v1881_v20  ;;  %1833 = vst.msk [vmem:[#allocation2 + $0x28] sm:$0xff] %vm1827_vm9, %v1742_v15 }
 0x2f1   : > { %v2067_v22 = vpop.f32.mrf.mxu2  ;;  %1641 = vst.msk [vmem:[#allocation2 + $0x30] sm:$0xff] %vm1634_vm8, %v1551_v21 }
 0x2f2   : > { %v2068_v23 = vadd.f32 %v3782_v50, %v2067_v22  ;;  %v2091_v24 = vpop.f32.mrf.mxu3 }
 0x2f3   : > { %v2092_v25 = vadd.f32 %v3782_v50, %v2091_v24 }
 0x2f4   : > { %2131 = vst [vmem:[%s3790_s20 + $0x80] sm:$0xff] %v2068_v23 }
 0x2f5   : > { %v1390_v26 = vpop.permute.xlu0 %1389  ;;  %v1889_v27 = vld [vmem:[#allocation2 + $0xe8] sm:$0xff]  ;;  %2139 = vst [vmem:[%s3790_s20 + $0xc0] sm:$0xff] %v2092_v25  ;;  %v1406_v38 = vpop.permute.xlu1 %1405 }
 0x2f6   : > { %1464 = vst.msk [vmem:[#allocation2 + $0xb0] sm:$0xff] %vm1441_vm6, %v1390_v26  ;;  %2516 = vmatmul.msk.f32.gmra.mxu3 %vm1901_vm10, %v1889_v27  ;;  %v1408_v30 = vpop.permute.xlu2 %1407 }
 0x2f7   : > { %1472 = vst.msk [vmem:[#allocation2 + $0xf0] sm:$0xff] %vm1441_vm6, %v1406_v38  ;;  %v1865_v29 = vld [vmem:[#allocation2 + $0x28] sm:$0xff] }
 0x2f8   : > { %1665 = vst.msk [vmem:[#allocation2 + $0xf0] sm:$0xff] %vm1634_vm8, %v1599_v17  ;;  %2492 = vmatmul.msk.f32.gmra.mxu0 %vm1901_vm10, %v1865_v29 }
 0x2f9   : > { %1473 = vst.msk [vmem:[#allocation2 + $0xf8] sm:$0xff] %vm1441_vm6, %v1408_v30 }
 0x2fb   : > { %v2019_v31 = vpop.f32.mrf.mxu0 }
 0x2fc   : > { %v2020_v42 = vadd.f32 %v3782_v50, %v2019_v31  ;;  %v2043_v47 = vpop.f32.mrf.mxu1 }
 0x2fd   : > { %v1758_v45 = vpop.permute.xlu0 %1757  ;;  %v2044_v60 = vadd.f32 %v3782_v50, %v2043_v47  ;;  %v1583_v61 = vpop.permute.xlu1 %1582 }
 0x2fe   : > { %2115 = vst [vmem:[%s3790_s20] sm:$0xff] %v2020_v42  ;;  %v1585_v34 = vpop.permute.xlu2 %1584 }
 0x2ff   : > { %1841 = vst.msk [vmem:[#allocation2 + $0x68] sm:$0xff] %vm1827_vm9, %v1758_v45 }
 0x300   : > { %2123 = vst [vmem:[%s3790_s20 + $0x40] sm:$0xff] %v2044_v60 }
 0x301   : > { %1657 = vst.msk [vmem:[#allocation2 + $0xb0] sm:$0xff] %vm1634_vm8, %v1583_v61 }
 0x305   : > { %v1776_v55 = vpop.permute.xlu0 %1775  ;;  %v1792_v3 = vpop.permute.xlu1 %1791 }
 0x306   : > { %1850 = vst.msk [vmem:[#allocation2 + $0xb0] sm:$0xff] %vm1827_vm9, %v1776_v55  ;;  %v1873_v63 = vld [vmem:[#allocation2 + $0x68] sm:$0xff]  ;;  %v1794_v35 = vpop.permute.xlu2 %1793 }
 0x307   : > { %2500 = vmatmul.msk.f32.gmra.mxu1 %vm1901_vm10, %v1873_v63  ;;  %1858 = vst.msk [vmem:[#allocation2 + $0xf0] sm:$0xff] %vm1827_vm9, %v1792_v3 }
 0x30a   : > { %v2070_v48 = vpop.f32.mrf.mxu2 }
 0x30b   : > { %v2071_v57 = vadd.f32 %v3782_v50, %v2070_v48  ;;  %v2094_v41 = vpop.f32.mrf.mxu3 }
 0x30c   : > { %v2095_v52 = vadd.f32 %v3782_v50, %v2094_v41 }
 0x30d   : > { %v1567_v59 = vpop.permute.xlu0 %1566  ;;  %v1882_v28 = vld [vmem:[#allocation2 + $0xb0] sm:$0xff]  ;;  %2132 = vst [vmem:[%s3790_s20 + $0x88] sm:$0xff] %v2071_v57  ;;  %v1392_v37 = vpop.permute.xlu1 %1391 }
 0x30e   : > { %1649 = vst.msk [vmem:[#allocation2 + $0x70] sm:$0xff] %vm1634_vm8, %v1567_v59  ;;  %2509 = vmatmul.msk.f32.gmra.mxu2 %vm1901_vm10, %v1882_v28  ;;  %v1890_v43 = vld [vmem:[#allocation2 + $0xf0] sm:$0xff]  ;;  %v2046_v54 = vpop.f32.mrf.mxu1  ;;  %v1746_v58 = vpop.permute.xlu2 %1745 }
 0x30f   : > { %2140 = vst [vmem:[%s3790_s20 + $0xc8] sm:$0xff] %v2095_v52  ;;  %2517 = vmatmul.msk.f32.gmra.mxu3 %vm1901_vm10, %v1890_v43  ;;  %v2047_v44 = vadd.f32 %v3782_v50, %v2046_v54 }
 0x310   : > { %1465 = vst.msk [vmem:[#allocation2 + $0xb8] sm:$0xff] %vm1441_vm6, %v1392_v37 }
 0x311   : > { %2124 = vst [vmem:[%s3790_s20 + $0x48] sm:$0xff] %v2047_v44 }
 0x312   : > { %1658 = vst.msk [vmem:[#allocation2 + $0xb8] sm:$0xff] %vm1634_vm8, %v1585_v34 }
 0x314   : > { %v2022_v1 = vpop.f32.mrf.mxu0 }
 0x315   : > { %v1744_v4 = vpop.permute.xlu0 %1743  ;;  %v2023_v2 = vadd.f32 %v3782_v50, %v2022_v1  ;;  %v1760_v5 = vpop.permute.xlu1 %1759 }
 0x316   : > { %1834 = vst.msk [vmem:[#allocation2 + $0x30] sm:$0xff] %vm1827_vm9, %v1744_v4 }
 0x317   : > { %2116 = vst [vmem:[%s3790_s20 + $0x8] sm:$0xff] %v2023_v2 }
 0x318   : > { %1842 = vst.msk [vmem:[#allocation2 + $0x70] sm:$0xff] %vm1827_vm9, %v1760_v5 }
 0x31d   : > { %v1601_v40 = vpop.permute.xlu0 %1600  ;;  %v1866_v6 = vld [vmem:[#allocation2 + $0x30] sm:$0xff]  ;;  %v1778_v46 = vpop.permute.xlu1 %1777 }
 0x31e   : > { %1666 = vst.msk [vmem:[#allocation2 + $0xf8] sm:$0xff] %vm1634_vm8, %v1601_v40  ;;  %2493 = vmatmul.msk.f32.gmra.mxu0 %vm1901_vm10, %v1866_v6 }
 0x31f   : > { %1851 = vst.msk [vmem:[#allocation2 + $0xb8] sm:$0xff] %vm1827_vm9, %v1778_v46  ;;  %v1874_v51 = vld [vmem:[#allocation2 + $0x70] sm:$0xff] }
 0x320   : > { %1859 = vst.msk [vmem:[#allocation2 + $0xf8] sm:$0xff] %vm1827_vm9, %v1794_v35  ;;  %2501 = vmatmul.msk.f32.gmra.mxu1 %vm1901_vm10, %v1874_v51 }
 0x323   : > { %v2073_v7 = vpop.f32.mrf.mxu2 }
 0x324   : > { %v2074_v8 = vadd.f32 %v3782_v50, %v2073_v7 }
 0x325   : > { %v1553_v53 = vpop.permute.xlu0 %1552  ;;  %v1569_v36 = vpop.permute.xlu1 %1568 }
 0x326   : > { %1642 = vst.msk [vmem:[#allocation2 + $0x38] sm:$0xff] %vm1634_vm8, %v1553_v53  ;;  %v1883_v9 = vld [vmem:[#allocation2 + $0xb8] sm:$0xff]  ;;  %v2025_v10 = vpop.f32.mrf.mxu0 }
 0x327   : > { %2133 = vst [vmem:[%s3790_s20 + $0x90] sm:$0xff] %v2074_v8  ;;  %2510 = vmatmul.msk.f32.gmra.mxu2 %vm1901_vm10, %v1883_v9  ;;  %v1891_v56 = vld [vmem:[#allocation2 + $0xf8] sm:$0xff]  ;;  %v2026_v62 = vadd.f32 %v3782_v50, %v2025_v10 }
 0x328   : > { %1650 = vst.msk [vmem:[#allocation2 + $0x78] sm:$0xff] %vm1634_vm8, %v1569_v36  ;;  %2518 = vmatmul.msk.f32.gmra.mxu3 %vm1901_vm10, %v1891_v56 }
 0x329   : > { %v2097_v33 = vpop.f32.mrf.mxu3  ;;  %1835 = vst.msk [vmem:[#allocation2 + $0x38] sm:$0xff] %vm1827_vm9, %v1746_v58 }
 0x32a   : > { %v2098_v11 = vadd.f32 %v3782_v50, %v2097_v33  ;;  %2117 = vst [vmem:[%s3790_s20 + $0x10] sm:$0xff] %v2026_v62 }
 0x32c   : > { %2141 = vst [vmem:[%s3790_s20 + $0xd0] sm:$0xff] %v2098_v11 }
 0x32d   : > { %v1762_v12 = vpop.permute.xlu0 %1761 }
 0x32e   : > { %1843 = vst.msk [vmem:[#allocation2 + $0x78] sm:$0xff] %vm1827_vm9, %v1762_v12 }
 0x330   : > { %v1867_v49 = vld [vmem:[#allocation2 + $0x38] sm:$0xff] }
 0x331   : > { %2494 = vmatmul.msk.f32.gmra.mxu0 %vm1901_vm10, %v1867_v49 }
 0x333   : > { %v2049_v39 = vpop.f32.mrf.mxu1 }
 0x334   : > { %v2050_v13 = vadd.f32 %v3782_v50, %v2049_v39 }
 0x335   : > { %v1875_v14 = vld [vmem:[#allocation2 + $0x78] sm:$0xff] }
 0x336   : > { %2125 = vst [vmem:[%s3790_s20 + $0x50] sm:$0xff] %v2050_v13  ;;  %2502 = vmatmul.msk.f32.gmra.mxu1 %vm1901_vm10, %v1875_v14 }
 0x341   : > { %v2076_v15 = vpop.f32.mrf.mxu2 }
 0x342   : > { %v2077_v0 = vadd.f32 %v3782_v50, %v2076_v15  ;;  %v2100_v32 = vpop.f32.mrf.mxu3 }
 0x343   : > { %v2101_v16 = vadd.f32 %v3782_v50, %v2100_v32 }
 0x344   : > { %2134 = vst [vmem:[%s3790_s20 + $0x98] sm:$0xff] %v2077_v0 }
 0x345   : > { %2142 = vst [vmem:[%s3790_s20 + $0xd8] sm:$0xff] %v2101_v16 }
 0x34b   : > { %v2028_v17 = vpop.f32.mrf.mxu0 }
 0x34c   : > { %v2029_v18 = vadd.f32 %v3782_v50, %v2028_v17  ;;  %v2052_v19 = vpop.f32.mrf.mxu1 }
 0x34d   : > { %v2053_v20 = vadd.f32 %v3782_v50, %v2052_v19 }
 0x34e   : > { %2118 = vst [vmem:[%s3790_s20 + $0x18] sm:$0xff] %v2029_v18 }
 0x34f   : > { %2126 = vst [vmem:[%s3790_s20 + $0x58] sm:$0xff] %v2053_v20 }
 0x35a   : > { %v2079_v21 = vpop.f32.mrf.mxu2 }
 0x35b   : > { %v2080_v22 = vadd.f32 %v3782_v50, %v2079_v21  ;;  %v2103_v23 = vpop.f32.mrf.mxu3 }
 0x35c   : > { %v2104_v24 = vadd.f32 %v3782_v50, %v2103_v23 }
 0x35d   : > { %2135 = vst [vmem:[%s3790_s20 + $0xa0] sm:$0xff] %v2080_v22  ;;  %v2055_v25 = vpop.f32.mrf.mxu1 }
 0x35e   : > { %2143 = vst [vmem:[%s3790_s20 + $0xe0] sm:$0xff] %v2104_v24  ;;  %v2056_v26 = vadd.f32 %v3782_v50, %v2055_v25 }
 0x360   : > { %2127 = vst [vmem:[%s3790_s20 + $0x60] sm:$0xff] %v2056_v26 }
 0x364   : > { %v2031_v27 = vpop.f32.mrf.mxu0 }
 0x365   : > { %v2032_v38 = vadd.f32 %v3782_v50, %v2031_v27 }
 0x367   : > { %2119 = vst [vmem:[%s3790_s20 + $0x20] sm:$0xff] %v2032_v38 }
 0x373   : > { %v2082_v29 = vpop.f32.mrf.mxu2 }
 0x374   : > { %v2083_v30 = vadd.f32 %v3782_v50, %v2082_v29 }
 0x375   : > { %v2034_v31 = vpop.f32.mrf.mxu0 }
 0x376   : > { %2136 = vst [vmem:[%s3790_s20 + $0xa8] sm:$0xff] %v2083_v30  ;;  %v2035_v42 = vadd.f32 %v3782_v50, %v2034_v31 }
 0x378   : > { %2120 = vst [vmem:[%s3790_s20 + $0x28] sm:$0xff] %v2035_v42 }
 0x379   : > { %v2106_v47 = vpop.f32.mrf.mxu3 }
 0x37a   : > { %v2107_v45 = vadd.f32 %v3782_v50, %v2106_v47 }
 0x37c   : > { %2144 = vst [vmem:[%s3790_s20 + $0xe8] sm:$0xff] %v2107_v45 }
 0x384   : > { %v2058_v60 = vpop.f32.mrf.mxu1 }
 0x385   : > { %v2059_v61 = vadd.f32 %v3782_v50, %v2058_v60 }
 0x387   : > { %2128 = vst [vmem:[%s3790_s20 + $0x68] sm:$0xff] %v2059_v61 }
 0x391   : > { %v2085_v55 = vpop.f32.mrf.mxu2 }
 0x392   : > { %v2086_v3 = vadd.f32 %v3782_v50, %v2085_v55  ;;  %v2109_v63 = vpop.f32.mrf.mxu3 }
 0x393   : > { %v2110_v48 = vadd.f32 %v3782_v50, %v2109_v63 }
 0x394   : > { %2137 = vst [vmem:[%s3790_s20 + $0xb0] sm:$0xff] %v2086_v3 }
 0x395   : > { %2145 = vst [vmem:[%s3790_s20 + $0xf0] sm:$0xff] %v2110_v48 }
 0x39b   : > { %v2037_v57 = vpop.f32.mrf.mxu0 }
 0x39c   : > { %v2038_v41 = vadd.f32 %v3782_v50, %v2037_v57 }
 0x39d   : > { %v2061_v52 = vpop.f32.mrf.mxu1 }
 0x39e   : > { %2121 = vst [vmem:[%s3790_s20 + $0x30] sm:$0xff] %v2038_v41  ;;  %v2062_v59 = vadd.f32 %v3782_v50, %v2061_v52 }
 0x3a0   : > { %2129 = vst [vmem:[%s3790_s20 + $0x70] sm:$0xff] %v2062_v59 }
 0x3aa   : > { %v2088_v28 = vpop.f32.mrf.mxu2 }
 0x3ab   : > { %v2089_v37 = vadd.f32 %v3782_v50, %v2088_v28  ;;  %v2112_v43 = vpop.f32.mrf.mxu3 }
 0x3ac   : > { %v2113_v54 = vadd.f32 %v3782_v50, %v2112_v43 }
 0x3ad   : > { %2138 = vst [vmem:[%s3790_s20 + $0xb8] sm:$0xff] %v2089_v37 }
 0x3ae   : > { %2146 = vst [vmem:[%s3790_s20 + $0xf8] sm:$0xff] %v2113_v54  ;;  %v2040_v44 = vpop.f32.mrf.mxu0 }
 0x3af   : > { %v2041_v34 = vadd.f32 %v3782_v50, %v2040_v44 }
 0x3b1   : > { %2122 = vst [vmem:[%s3790_s20 + $0x38] sm:$0xff] %v2041_v34 }
 0x3b3   : > { %v2064_v1 = vpop.f32.mrf.mxu1 }
 0x3b4   : > { %v2065_v4 = vadd.f32 %v3782_v50, %v2064_v1 }
 0x3b6   : > { %2130 = vst [vmem:[%s3790_s20 + $0x78] sm:$0xff] %v2065_v4 }
 0x3b7 PF: > { %s13_s14 = sadd.s32 1, %s2593_s14   ;;  %s3991_s12 = smov %s2589_s13 }
 0x3b8   : > { %p10_p5 = scmp.ge.s32.totalorder %s13_s14, 4   ;;  %s3992_s13 = smov %s3994_s15 }
 0x3ba   :  { %12 = sbr.rel (!%p10_p5) target bundleno = 2 (0x2), region = 71 }

</bundles_post_ra>
